<compile_context>
chip_gen: v6e
topology: v6e:2x2x1
jax: 0.10.0
libtpu: 0.0.40
codegen_flags: <defaults>
</compile_context>

<pallas_src>
import functools

import numpy as np
import jax
import jax.numpy as jnp
from jax.experimental import pallas as pl
from jax.experimental.pallas import tpu as pltpu


# ----------------------------------------------------------------------------
# helpers (host-side, numpy / tiny jnp ops)
# ----------------------------------------------------------------------------
def _round_up(x, m):
    return (x + m - 1) // m * m


def _upsample_filt_1d(size):
    # 1-D factor of utils.upsample_filt (the 2-D filter is its outer product).
    f = (size + 1) // 2
    center = f - 1 if size % 2 == 1 else f - 0.5
    return 1.0 - np.abs(np.arange(size, dtype=np.float64) - center) / f


def _upsample_matrix_1d(out_len, in_len, factor):
    # U[I, i] = kernel tap linking input row i to output row I of
    # conv_transpose(stride=factor, padding=factor//2, k=2*factor-factor%2),
    # output length fixed to out_len (this absorbs output_padding).
    k = 2 * factor - factor % 2
    pad = factor // 2
    v = _upsample_filt_1d(k)
    U = np.zeros((out_len, in_len), np.float64)
    for I in range(out_len):
        for i in range(in_len):
            t = I + pad - i * factor
            if 0 <= t < k:
                U[I, i] = v[t]
    return U


def _build_up_matrix(H, W, h, w, factor):
    # up[i*w+j, I*W+J] = Uh[I,i]*Uw[J,j]  so  y_up = y @ up  (Cout,h*w)->(Cout,H*W)
    # TODO(synk): separable Uh @ Y @ Uw^T at real resolutions (dense matrix is
    # O((HW)^2) and would not fit v7x's 64 MiB VMEM at e.g. 64x64 -> 128x128).
    Uh = _upsample_matrix_1d(H, h, factor)
    Uw = _upsample_matrix_1d(W, w, factor)
    M = np.einsum("Ii,Jj->ijIJ", Uh, Uw).reshape(h * w, H * W)
    return jnp.asarray(M, dtype=jnp.float32)


def _im2col_weight(w_hwio):
    # (3,3,Cin,Cout) -> (Cout, 9*CP), CP = Cin rounded up to the 8-sublane tile;
    # column ordering = [tap (dy*3+dx) outer, channel inner] to match the kernel.
    kh, kw, cin, cout = w_hwio.shape
    cp = _round_up(cin, 8)
    wp = jnp.pad(w_hwio, ((0, 0), (0, 0), (0, cp - cin), (0, 0)))
    return jnp.transpose(wp, (3, 0, 1, 2)).reshape(cout, kh * kw * cp)


def _halo_geometry(W, HW):
    """(lpad, stride): lane-aligned, multiples of W, with >= W+1 halo room."""
    lpad = 128
    while lpad < W + 1 or lpad % W != 0:
        lpad += 128
    stride = _round_up(HW + W + 1, 128)      # per-image slot incl. bottom halo
    while stride % W != 0:
        stride += 128
    return lpad, stride


# ----------------------------------------------------------------------------
# fused kernel
# ----------------------------------------------------------------------------
def _adap_branch(x_ref, xp_ref, w_ref, gate, *, W, HW, lpad, stride, bblk, eps):
    """Conv2d(3x3,pad=1) + InstanceNorm2d + ReLU + sigmoid-gate, bblk images.

    x_ref : (bblk, CP, HW)  channel-major, flattened spatial (channels padded)
    xp_ref: (CP, lpad + bblk*stride + lpad) persistent VMEM halo strip
    w_ref : (Cout, 9*CP)    im2col weight matrix
    returns a list of bblk (Cout, HW) float32 arrays
    """
    CP = xp_ref.shape[0]
    PACK = bblk * stride
    gap = stride - HW
    rpad = xp_ref.shape[1] - lpad - PACK

    # Zero ONLY the halo margins; the image interiors are fully overwritten
    # below (all CP rows, since channels were padded in the wrapper).  Doing
    # this every step keeps the margins zero under any core sharding of the
    # grid (no reliance on program_id==0 initialization).
    xp_ref[:, 0:lpad] = jnp.zeros((CP, lpad), jnp.float32)
    xp_ref[:, lpad + PACK:lpad + PACK + rpad] = jnp.zeros((CP, rpad), jnp.float32)
    for b in range(bblk):
        off = lpad + b * stride
        xp_ref[:, off:off + HW] = x_ref[b]
        xp_ref[:, off + HW:off + stride] = jnp.zeros((CP, gap), jnp.float32)

    # Column-wrap masks (left/right conv padding in the flat layout). W is a
    # power of two in practice, so the mod is a single bitwise AND.  stride and
    # lpad are multiples of W, so lane_index mod W == within-image column.
    lane = jax.lax.broadcasted_iota(jnp.int32, (CP, PACK), 1)
    col = (lane & (W - 1)) if (W & (W - 1)) == 0 else (lane % W)
    first_col = col == 0
    last_col = col == W - 1

    taps = []
    for dy in range(3):
        for dx in range(3):
            start = lpad + (dy - 1) * W + (dx - 1)
            t = xp_ref[:, start:start + PACK]          # (CP, PACK) shifted load
            if dx == 0:                                # reads prev row's last col
                t = jnp.where(first_col, 0.0, t)
            elif dx == 2:                              # reads next row's first col
                t = jnp.where(last_col, 0.0, t)
            taps.append(t)
    pmat = jnp.concatenate(taps, axis=0)               # (9*CP, PACK) im2col patch
    # TODO(synk): bf16 pmat/w_ref (f32 accumulate) once channel counts make the
    # MXU the bottleneck; at these sizes the kernel is overhead-bound.
    y = jnp.dot(w_ref[...], pmat,
                preferred_element_type=jnp.float32)    # single MXU matmul

    outs = []
    for b in range(bblk):
        yb = y[:, b * stride:b * stride + HW]          # drop halo-gap lanes
        # InstanceNorm2d(affine=False): per-channel stats over space, biased var.
        mean = jnp.mean(yb, axis=1, keepdims=True)
        yc = yb - mean
        var = jnp.mean(yc * yc, axis=1, keepdims=True)
        # sigmoid gate folded into the normalization scale (gate > 0).
        scale = gate * jax.lax.rsqrt(var + eps)
        outs.append(jnp.maximum(yc * scale, 0.0))
    return outs


def _refine_kernel_up(gates_ref, x1_ref, x2_ref, w1_ref, w2_ref, up_ref, o_ref,
                      xp1_ref, xp2_ref, *, geo1, geo2, bblk, eps):
    y1 = _adap_branch(x1_ref, xp1_ref, w1_ref, gates_ref[0],
                      bblk=bblk, eps=eps, **geo1)
    y2 = _adap_branch(x2_ref, xp2_ref, w2_ref, gates_ref[1],
                      bblk=bblk, eps=eps, **geo2)
    up = up_ref[...]
    for b in range(bblk):
        # bilinear conv_transpose2d (depthwise) as one matmul, fused with add.
        y2u = jnp.dot(y2[b], up, preferred_element_type=jnp.float32)
        o_ref[b] = (y1[b] + y2u).astype(o_ref.dtype)


def _refine_kernel_noup(gates_ref, x1_ref, x2_ref, w1_ref, w2_ref, o_ref,
                        xp1_ref, xp2_ref, *, geo1, geo2, bblk, eps):
    y1 = _adap_branch(x1_ref, xp1_ref, w1_ref, gates_ref[0],
                      bblk=bblk, eps=eps, **geo1)
    y2 = _adap_branch(x2_ref, xp2_ref, w2_ref, gates_ref[1],
                      bblk=bblk, eps=eps, **geo2)
    for b in range(bblk):
        o_ref[b] = (y1[b] + y2[b]).astype(o_ref.dtype)


# ----------------------------------------------------------------------------
# wrapper
# ----------------------------------------------------------------------------
@functools.partial(jax.jit, static_argnames=("factor",))
def refine_block_forward(x1_nchw, x2_nchw, w1_mat, w2_mat, g1, g2, *, factor):
    B, C1, H, W = x1_nchw.shape
    B2, C2, h, w = x2_nchw.shape
    assert B == B2
    Cout = w1_mat.shape[0]
    HW, hw = H * W, h * w
    CP1 = w1_mat.shape[1] // 9
    CP2 = w2_mat.shape[1] // 9

    # channel-major, flattened-spatial (free reshape of NCHW); pad channels to
    # the 8-sublane tile so the kernel's interior stores cover every scratch row.
    x1f = jnp.pad(x1_nchw.reshape(B, C1, HW).astype(jnp.float32),
                  ((0, 0), (0, CP1 - C1), (0, 0)))
    x2f = jnp.pad(x2_nchw.reshape(B, C2, hw).astype(jnp.float32),
                  ((0, 0), (0, CP2 - C2), (0, 0)))

    # images per grid step: amortize per-step overhead with wide packed matmuls,
    # but keep >= 2 grid steps when B >= 2 so v7x can use both TensorCores.
    bblk = B // 2 if (B >= 2 and B % 2 == 0) else 1
    while bblk > 4 and bblk % 2 == 0:       # soft cap on the packed strip width
        bblk //= 2
    nsteps = B // bblk

    lpad1, stride1 = _halo_geometry(W, HW)
    lpad2, stride2 = _halo_geometry(w, hw)
    geo1 = dict(W=W, HW=HW, lpad=lpad1, stride=stride1)
    geo2 = dict(W=w, HW=hw, lpad=lpad2, stride=stride2)

    gates = jnp.stack([jax.nn.sigmoid(g1), jax.nn.sigmoid(g2)]).astype(jnp.float32)

    in_specs = [
        pl.BlockSpec(memory_space=pltpu.MemorySpace.SMEM),        # gates (2,)
        pl.BlockSpec((bblk, CP1, HW), lambda i: (i, 0, 0)),       # x1 (bblk imgs)
        pl.BlockSpec((bblk, CP2, hw), lambda i: (i, 0, 0)),       # x2 (bblk imgs)
        pl.BlockSpec((Cout, 9 * CP1), lambda i: (0, 0)),          # w1 (resident)
        pl.BlockSpec((Cout, 9 * CP2), lambda i: (0, 0)),          # w2 (resident)
    ]
    scratch = [
        pltpu.VMEM((CP1, lpad1 + bblk * stride1 + lpad1), jnp.float32),
        pltpu.VMEM((CP2, lpad2 + bblk * stride2 + lpad2), jnp.float32),
    ]

    if factor >= 2:
        up = _build_up_matrix(H, W, h, w, factor)
        kern = functools.partial(_refine_kernel_up, geo1=geo1, geo2=geo2,
                                 bblk=bblk, eps=1e-5)
        in_specs.append(pl.BlockSpec((hw, HW), lambda i: (0, 0)))  # up (resident)
        args = (gates, x1f, x2f, w1_mat, w2_mat, up)
    else:
        assert (h, w) == (H, W)
        kern = functools.partial(_refine_kernel_noup, geo1=geo1, geo2=geo2,
                                 bblk=bblk, eps=1e-5)
        args = (gates, x1f, x2f, w1_mat, w2_mat)

    out_flat = pl.pallas_call(
        kern,
        out_shape=jax.ShapeDtypeStruct((B, Cout, HW), jnp.float32),
        grid=(nsteps,),
        in_specs=in_specs,
        out_specs=pl.BlockSpec((bblk, Cout, HW), lambda i: (i, 0, 0)),
        scratch_shapes=scratch,
        compiler_params=pltpu.CompilerParams(
            dimension_semantics=("parallel",),        # shard batch steps (v7x)
            vmem_limit_bytes=32 * 1024 * 1024),       # explicit (v5e default 16MiB)
    )(*args)
    return out_flat.reshape(B, Cout, H, W)


class RefineBlock21:
    """Pallas/TPU equivalent of the PyTorch Refine_block2_1 module."""

    def __init__(self, in_channel, out_channel, factor, key):
        C1, C2 = in_channel
        k1, k2, k3, k4 = jax.random.split(key, 4)
        # conv weights kept in HWIO; deterministic synthetic init
        self.w1_hwio = (0.1 * jax.random.normal(
            k1, (3, 3, C1, out_channel))).astype(jnp.float32)
        self.w2_hwio = (0.1 * jax.random.normal(
            k2, (3, 3, C2, out_channel))).astype(jnp.float32)
        # Conv2d biases kept for parameter parity but NOT fed to the kernel:
        # with InstanceNorm2d(affine=False) directly after the conv, a per-
        # channel constant is exactly removed by the mean subtraction.
        self.b1 = (0.1 * jax.random.normal(k3, (out_channel,))).astype(jnp.float32)
        self.b2 = (0.1 * jax.random.normal(k4, (out_channel,))).astype(jnp.float32)
        # adap_conv gate parameters: nn.Parameter(torch.Tensor([0.0]))
        self.g1 = jnp.zeros((), jnp.float32)
        self.g2 = jnp.zeros((), jnp.float32)
        self.factor = factor
        self.out_channel = out_channel
        # precomputed im2col weight matrices (channels padded to 8 sublanes)
        self.w1_mat = _im2col_weight(self.w1_hwio)
        self.w2_mat = _im2col_weight(self.w2_hwio)

    def __call__(self, x1_nchw, x2_nchw):
        return refine_block_forward(x1_nchw, x2_nchw, self.w1_mat, self.w2_mat,
                                    self.g1, self.g2, factor=self.factor)


# ----------------------------------------------------------------------------
# pure-JAX reference (for a numerical self-check)
# ----------------------------------------------------------------------------
def _reference_forward(block, x1, x2):
    def adap(x, w_hwio, bias, g):
        y = jax.lax.conv_general_dilated(
            x.astype(jnp.float32), w_hwio, (1, 1), ((1, 1), (1, 1)),
            dimension_numbers=("NCHW", "HWIO", "NCHW"),
            precision=jax.lax.Precision.HIGHEST)
        y = y + bias[None, :, None, None]
        m = jnp.mean(y, axis=(2, 3), keepdims=True)
        v = jnp.mean((y - m) ** 2, axis=(2, 3), keepdims=True)
        y = (y - m) * jax.lax.rsqrt(v + 1e-5)
        return jnp.maximum(y, 0.0) * jax.nn.sigmoid(g)

    y1 = adap(x1, block.w1_hwio, block.b1, block.g1)
    y2 = adap(x2, block.w2_hwio, block.b2, block.g2)
    f = block.factor
    if f >= 2:
        C = block.out_channel
        k = 2 * f - f % 2
        p = f // 2
        H, W = y1.shape[2], y1.shape[3]
        h, w = y2.shape[2], y2.shape[3]
        oph, opw = H - h * f, W - w * f
        filt = _upsample_filt_1d(k)
        k2d = np.outer(filt, filt)[::-1, ::-1].astype(np.float32)
        wdw = jnp.asarray(k2d)[:, :, None, None] * jnp.eye(C, dtype=jnp.float32)[None, None]
        y2 = jax.lax.conv_general_dilated(
            y2, wdw, (1, 1),
            ((k - 1 - p, k - 1 - p + oph), (k - 1 - p, k - 1 - p + opw)),
            lhs_dilation=(f, f),
            dimension_numbers=("NCHW", "HWIO", "NCHW"),
            precision=jax.lax.Precision.HIGHEST)
    return y1 + y2


if __name__ == "__main__":
    # B=4 exercises the packed path (2 images per grid step, 2 grid steps).
    B, C1, C2, Cout, H, W, factor = 4, 4, 6, 8, 16, 16, 2
    key = jax.random.PRNGKey(0)
    k_in1, k_in2, k_par = jax.random.split(key, 3)
    x1 = jax.random.normal(k_in1, (B, C1, H, W), jnp.float32)               # input[0]
    x2 = jax.random.normal(k_in2, (B, C2, H // factor, W // factor),
                           jnp.float32)                                     # input[1]

    block = RefineBlock21((C1, C2), Cout, factor, k_par)
    out = jax.block_until_ready(block(x1, x2))
    assert out.shape == (B, Cout, H, W)
    assert bool(jnp.all(jnp.isfinite(out)))

    ref = jax.block_until_ready(_reference_forward(block, x1, x2))
    max_err = float(jnp.max(jnp.abs(out - ref)))
    assert max_err < 3e-3, f"mismatch vs reference: max abs err = {max_err}"
    print("KERNEL_OK")
</pallas_src>

<mosaic_0001>
module attributes {stable_mosaic.version = 11 : i64} {
  func.func @_refine_kernel_up(%arg0: i32, %arg1: memref<2xf32, #tpu.memory_space<smem>>, %arg2: memref<2x8x256xf32, #tpu.memory_space<vmem>>, %arg3: memref<2x8x64xf32, #tpu.memory_space<vmem>>, %arg4: memref<8x72xf32, #tpu.memory_space<vmem>>, %arg5: memref<8x72xf32, #tpu.memory_space<vmem>>, %arg6: memref<64x256xf32, #tpu.memory_space<vmem>>, %arg7: memref<2x8x256xf32, #tpu.memory_space<vmem>>, %arg8: memref<8x1024xf32, #tpu.memory_space<vmem>>, %arg9: memref<8x512xf32, #tpu.memory_space<vmem>>) attributes {dimension_semantics = [#tpu.dimension_semantics<parallel>], iteration_bounds = array<i64: 2>, scalar_prefetch = 0 : i64, scratch_operands = 2 : i64, tpu.core_type = #tpu.core_type<tc>, window_params = [{transform_indices = @transform_0, window_bounds = array<i64: 2>}, {transform_indices = @transform_1, window_bounds = array<i64: 2, 8, 256>}, {transform_indices = @transform_2, window_bounds = array<i64: 2, 8, 64>}, {pipeline_mode = #tpu.pipeline_mode<synchronous>, transform_indices = @transform_3, window_bounds = array<i64: 8, 72>}, {pipeline_mode = #tpu.pipeline_mode<synchronous>, transform_indices = @transform_4, window_bounds = array<i64: 8, 72>}, {pipeline_mode = #tpu.pipeline_mode<synchronous>, transform_indices = @transform_5, window_bounds = array<i64: 64, 256>}, {transform_indices = @transform_6, window_bounds = array<i64: 2, 8, 256>}]} {
    %c0 = arith.constant 0 : index
    %0 = memref.load %arg1[%c0] : memref<2xf32, #tpu.memory_space<smem>>
    %cst = arith.constant 0.000000e+00 : f32
    %1 = vector.broadcast %cst : f32 to vector<8x128xf32>
    %c0_0 = arith.constant 0 : index
    %c0_1 = arith.constant 0 : index
    %2 = vector.load %arg8[%c0_0, %c0_1] : memref<8x1024xf32, #tpu.memory_space<vmem>>, vector<8x128xf32>
    tpu.vector_store %arg8[%c0_0, %c0_1], %1 {strides = array<i32>} : memref<8x1024xf32, #tpu.memory_space<vmem>>, vector<8x128xf32>,
    %cst_2 = arith.constant 0.000000e+00 : f32
    %3 = vector.broadcast %cst_2 : f32 to vector<8x128xf32>
    %c0_3 = arith.constant 0 : index
    %c896 = arith.constant 896 : index
    %4 = vector.load %arg8[%c0_3, %c896] : memref<8x1024xf32, #tpu.memory_space<vmem>>, vector<8x128xf32>
    tpu.vector_store %arg8[%c0_3, %c896], %3 {strides = array<i32>} : memref<8x1024xf32, #tpu.memory_space<vmem>>, vector<8x128xf32>,
    %c0_4 = arith.constant 0 : index
    %c0_5 = arith.constant 0 : index
    %c0_6 = arith.constant 0 : index
    %5 = vector.load %arg2[%c0_4, %c0_5, %c0_6] : memref<2x8x256xf32, #tpu.memory_space<vmem>>, vector<1x8x256xf32>
    %6 = vector.shape_cast %5 : vector<1x8x256xf32> to vector<8x256xf32>
    %c0_7 = arith.constant 0 : index
    %c128 = arith.constant 128 : index
    %7 = vector.load %arg8[%c0_7, %c128] : memref<8x1024xf32, #tpu.memory_space<vmem>>, vector<8x256xf32>
    tpu.vector_store %arg8[%c0_7, %c128], %6 {strides = array<i32>} : memref<8x1024xf32, #tpu.memory_space<vmem>>, vector<8x256xf32>,
    %cst_8 = arith.constant 0.000000e+00 : f32
    %8 = vector.broadcast %cst_8 : f32 to vector<8x128xf32>
    %c0_9 = arith.constant 0 : index
    %c384 = arith.constant 384 : index
    %9 = vector.load %arg8[%c0_9, %c384] : memref<8x1024xf32, #tpu.memory_space<vmem>>, vector<8x128xf32>
    tpu.vector_store %arg8[%c0_9, %c384], %8 {strides = array<i32>} : memref<8x1024xf32, #tpu.memory_space<vmem>>, vector<8x128xf32>,
    %c1 = arith.constant 1 : index
    %c0_10 = arith.constant 0 : index
    %c0_11 = arith.constant 0 : index
    %10 = vector.load %arg2[%c1, %c0_10, %c0_11] : memref<2x8x256xf32, #tpu.memory_space<vmem>>, vector<1x8x256xf32>
    %11 = vector.shape_cast %10 : vector<1x8x256xf32> to vector<8x256xf32>
    %c0_12 = arith.constant 0 : index
    %c512 = arith.constant 512 : index
    %12 = vector.load %arg8[%c0_12, %c512] : memref<8x1024xf32, #tpu.memory_space<vmem>>, vector<8x256xf32>
    tpu.vector_store %arg8[%c0_12, %c512], %11 {strides = array<i32>} : memref<8x1024xf32, #tpu.memory_space<vmem>>, vector<8x256xf32>,
    %cst_13 = arith.constant 0.000000e+00 : f32
    %13 = vector.broadcast %cst_13 : f32 to vector<8x128xf32>
    %c0_14 = arith.constant 0 : index
    %c768 = arith.constant 768 : index
    %14 = vector.load %arg8[%c0_14, %c768] : memref<8x1024xf32, #tpu.memory_space<vmem>>, vector<8x128xf32>
    tpu.vector_store %arg8[%c0_14, %c768], %13 {strides = array<i32>} : memref<8x1024xf32, #tpu.memory_space<vmem>>, vector<8x128xf32>,
    %15 = tpu.iota {dimensions = array<i32: 1>} : vector<8x768xi32>
    %c15_i32 = arith.constant 15 : i32
    %16 = vector.broadcast %c15_i32 : i32 to vector<8x768xi32>
    %17 = arith.andi %15, %16 : vector<8x768xi32>
    %c0_i32 = arith.constant 0 : i32
    %18 = vector.broadcast %c0_i32 : i32 to vector<8x768xi32>
    %19 = arith.cmpi eq, %17, %18 : vector<8x768xi32>
    %c15_i32_15 = arith.constant 15 : i32
    %20 = vector.broadcast %c15_i32_15 : i32 to vector<8x768xi32>
    %21 = arith.cmpi eq, %17, %20 : vector<8x768xi32>
    %c0_16 = arith.constant 0 : index
    %c111 = arith.constant 111 : index
    %22 = vector.load %arg8[%c0_16, %c111] : memref<8x1024xf32, #tpu.memory_space<vmem>>, vector<8x768xf32>
    %cst_17 = arith.constant 0.000000e+00 : f32
    %23 = vector.broadcast %cst_17 : f32 to vector<8x768xf32>
    %24 = arith.select %19, %23, %22 : vector<8x768xi1>, vector<8x768xf32>
    %c0_18 = arith.constant 0 : index
    %c112 = arith.constant 112 : index
    %25 = vector.load %arg8[%c0_18, %c112] : memref<8x1024xf32, #tpu.memory_space<vmem>>, vector<8x768xf32>
    %c0_19 = arith.constant 0 : index
    %c113 = arith.constant 113 : index
    %26 = vector.load %arg8[%c0_19, %c113] : memref<8x1024xf32, #tpu.memory_space<vmem>>, vector<8x768xf32>
    %cst_20 = arith.constant 0.000000e+00 : f32
    %27 = vector.broadcast %cst_20 : f32 to vector<8x768xf32>
    %28 = arith.select %21, %27, %26 : vector<8x768xi1>, vector<8x768xf32>
    %c0_21 = arith.constant 0 : index
    %c127 = arith.constant 127 : index
    %29 = vector.load %arg8[%c0_21, %c127] : memref<8x1024xf32, #tpu.memory_space<vmem>>, vector<8x768xf32>
    %cst_22 = arith.constant 0.000000e+00 : f32
    %30 = vector.broadcast %cst_22 : f32 to vector<8x768xf32>
    %31 = arith.select %19, %30, %29 : vector<8x768xi1>, vector<8x768xf32>
    %c0_23 = arith.constant 0 : index
    %c128_24 = arith.constant 128 : index
    %32 = vector.load %arg8[%c0_23, %c128_24] : memref<8x1024xf32, #tpu.memory_space<vmem>>, vector<8x768xf32>
    %c0_25 = arith.constant 0 : index
    %c129 = arith.constant 129 : index
    %33 = vector.load %arg8[%c0_25, %c129] : memref<8x1024xf32, #tpu.memory_space<vmem>>, vector<8x768xf32>
    %cst_26 = arith.constant 0.000000e+00 : f32
    %34 = vector.broadcast %cst_26 : f32 to vector<8x768xf32>
    %35 = arith.select %21, %34, %33 : vector<8x768xi1>, vector<8x768xf32>
    %c0_27 = arith.constant 0 : index
    %c143 = arith.constant 143 : index
    %36 = vector.load %arg8[%c0_27, %c143] : memref<8x1024xf32, #tpu.memory_space<vmem>>, vector<8x768xf32>
    %cst_28 = arith.constant 0.000000e+00 : f32
    %37 = vector.broadcast %cst_28 : f32 to vector<8x768xf32>
    %38 = arith.select %19, %37, %36 : vector<8x768xi1>, vector<8x768xf32>
    %c0_29 = arith.constant 0 : index
    %c144 = arith.constant 144 : index
    %39 = vector.load %arg8[%c0_29, %c144] : memref<8x1024xf32, #tpu.memory_space<vmem>>, vector<8x768xf32>
    %c0_30 = arith.constant 0 : index
    %c145 = arith.constant 145 : index
    %40 = vector.load %arg8[%c0_30, %c145] : memref<8x1024xf32, #tpu.memory_space<vmem>>, vector<8x768xf32>
    %cst_31 = arith.constant 0.000000e+00 : f32
    %41 = vector.broadcast %cst_31 : f32 to vector<8x768xf32>
    %42 = arith.select %21, %41, %40 : vector<8x768xi1>, vector<8x768xf32>
    %43 = tpu.concatenate %24, %25, %28, %31, %32, %35, %38, %39, %42 in 0 : vector<8x768xf32>, vector<8x768xf32>, vector<8x768xf32>, vector<8x768xf32>, vector<8x768xf32>, vector<8x768xf32>, vector<8x768xf32>, vector<8x768xf32>, vector<8x768xf32> -> vector<72x768xf32>
    %c0_32 = arith.constant 0 : index
    %c0_33 = arith.constant 0 : index
    %44 = vector.load %arg4[%c0_32, %c0_33] : memref<8x72xf32, #tpu.memory_space<vmem>>, vector<8x72xf32>
    %cst_34 = arith.constant dense<0.000000e+00> : vector<8x768xf32>
    %45 = tpu.matmul %44, %43, %cst_34 {dimension_numbers = #tpu.dot_dimension_numbers<[1], [0], [0], [1], [0, 0, 1, 1], [], []>} : vector<8x72xf32>, vector<72x768xf32>, vector<8x768xf32> -> vector<8x768xf32>
    %46 = vector.extract_strided_slice %45 {offsets = [0, 0], sizes = [8, 256], strides = [1, 1]} : vector<8x768xf32> to vector<8x256xf32>
    %cst_35 = arith.constant dense<0.000000e+00> : vector<8xf32>
    %47 = vector.multi_reduction <add>, %46, %cst_35 [1] : vector<8x256xf32> to vector<8xf32>
    %48 = vector.shape_cast %47 : vector<8xf32> to vector<8x1xf32>
    %cst_36 = arith.constant 2.560000e+02 : f32
    %49 = vector.broadcast %cst_36 : f32 to vector<8x1xf32>
    %50 = arith.divf %48, %49 : vector<8x1xf32>
    %51 = vector.broadcast %50 : vector<8x1xf32> to vector<8x256xf32>
    %52 = arith.subf %46, %51 : vector<8x256xf32>
    %53 = arith.mulf %52, %52 : vector<8x256xf32>
    %cst_37 = arith.constant dense<0.000000e+00> : vector<8xf32>
    %54 = vector.multi_reduction <add>, %53, %cst_37 [1] : vector<8x256xf32> to vector<8xf32>
    %55 = vector.shape_cast %54 : vector<8xf32> to vector<8x1xf32>
    %cst_38 = arith.constant 2.560000e+02 : f32
    %56 = vector.broadcast %cst_38 : f32 to vector<8x1xf32>
    %57 = arith.divf %55, %56 : vector<8x1xf32>
    %cst_39 = arith.constant 9.99999974E-6 : f32
    %58 = vector.broadcast %cst_39 : f32 to vector<8x1xf32>
    %59 = arith.addf %57, %58 : vector<8x1xf32>
    %60 = math.rsqrt %59 : vector<8x1xf32>
    %61 = vector.broadcast %0 : f32 to vector<8x1xf32>
    %62 = arith.mulf %61, %60 : vector<8x1xf32>
    %63 = vector.broadcast %62 : vector<8x1xf32> to vector<8x256xf32>
    %64 = arith.mulf %52, %63 : vector<8x256xf32>
    %cst_40 = arith.constant 0.000000e+00 : f32
    %65 = vector.broadcast %cst_40 : f32 to vector<8x256xf32>
    %66 = arith.maximumf %64, %65 : vector<8x256xf32>
    %67 = vector.extract_strided_slice %45 {offsets = [0, 384], sizes = [8, 256], strides = [1, 1]} : vector<8x768xf32> to vector<8x256xf32>
    %cst_41 = arith.constant dense<0.000000e+00> : vector<8xf32>
    %68 = vector.multi_reduction <add>, %67, %cst_41 [1] : vector<8x256xf32> to vector<8xf32>
    %69 = vector.shape_cast %68 : vector<8xf32> to vector<8x1xf32>
    %cst_42 = arith.constant 2.560000e+02 : f32
    %70 = vector.broadcast %cst_42 : f32 to vector<8x1xf32>
    %71 = arith.divf %69, %70 : vector<8x1xf32>
    %72 = vector.broadcast %71 : vector<8x1xf32> to vector<8x256xf32>
    %73 = arith.subf %67, %72 : vector<8x256xf32>
    %74 = arith.mulf %73, %73 : vector<8x256xf32>
    %cst_43 = arith.constant dense<0.000000e+00> : vector<8xf32>
    %75 = vector.multi_reduction <add>, %74, %cst_43 [1] : vector<8x256xf32> to vector<8xf32>
    %76 = vector.shape_cast %75 : vector<8xf32> to vector<8x1xf32>
    %cst_44 = arith.constant 2.560000e+02 : f32
    %77 = vector.broadcast %cst_44 : f32 to vector<8x1xf32>
    %78 = arith.divf %76, %77 : vector<8x1xf32>
    %cst_45 = arith.constant 9.99999974E-6 : f32
    %79 = vector.broadcast %cst_45 : f32 to vector<8x1xf32>
    %80 = arith.addf %78, %79 : vector<8x1xf32>
    %81 = math.rsqrt %80 : vector<8x1xf32>
    %82 = vector.broadcast %0 : f32 to vector<8x1xf32>
    %83 = arith.mulf %82, %81 : vector<8x1xf32>
    %84 = vector.broadcast %83 : vector<8x1xf32> to vector<8x256xf32>
    %85 = arith.mulf %73, %84 : vector<8x256xf32>
    %cst_46 = arith.constant 0.000000e+00 : f32
    %86 = vector.broadcast %cst_46 : f32 to vector<8x256xf32>
    %87 = arith.maximumf %85, %86 : vector<8x256xf32>
    %c1_47 = arith.constant 1 : index
    %88 = memref.load %arg1[%c1_47] : memref<2xf32, #tpu.memory_space<smem>>
    %cst_48 = arith.constant 0.000000e+00 : f32
    %89 = vector.broadcast %cst_48 : f32 to vector<8x128xf32>
    %c0_49 = arith.constant 0 : index
    %c0_50 = arith.constant 0 : index
    %90 = vector.load %arg9[%c0_49, %c0_50] : memref<8x512xf32, #tpu.memory_space<vmem>>, vector<8x128xf32>
    tpu.vector_store %arg9[%c0_49, %c0_50], %89 {strides = array<i32>} : memref<8x512xf32, #tpu.memory_space<vmem>>, vector<8x128xf32>,
    %cst_51 = arith.constant 0.000000e+00 : f32
    %91 = vector.broadcast %cst_51 : f32 to vector<8x128xf32>
    %c0_52 = arith.constant 0 : index
    %c384_53 = arith.constant 384 : index
    %92 = vector.load %arg9[%c0_52, %c384_53] : memref<8x512xf32, #tpu.memory_space<vmem>>, vector<8x128xf32>
    tpu.vector_store %arg9[%c0_52, %c384_53], %91 {strides = array<i32>} : memref<8x512xf32, #tpu.memory_space<vmem>>, vector<8x128xf32>,
    %c0_54 = arith.constant 0 : index
    %c0_55 = arith.constant 0 : index
    %c0_56 = arith.constant 0 : index
    %93 = vector.load %arg3[%c0_54, %c0_55, %c0_56] : memref<2x8x64xf32, #tpu.memory_space<vmem>>, vector<1x8x64xf32>
    %94 = vector.shape_cast %93 : vector<1x8x64xf32> to vector<8x64xf32>
    %c0_57 = arith.constant 0 : index
    %c128_58 = arith.constant 128 : index
    %95 = vector.load %arg9[%c0_57, %c128_58] : memref<8x512xf32, #tpu.memory_space<vmem>>, vector<8x64xf32>
    tpu.vector_store %arg9[%c0_57, %c128_58], %94 {strides = array<i32>} : memref<8x512xf32, #tpu.memory_space<vmem>>, vector<8x64xf32>,
    %cst_59 = arith.constant 0.000000e+00 : f32
    %96 = vector.broadcast %cst_59 : f32 to vector<8x64xf32>
    %c0_60 = arith.constant 0 : index
    %c192 = arith.constant 192 : index
    %97 = vector.load %arg9[%c0_60, %c192] : memref<8x512xf32, #tpu.memory_space<vmem>>, vector<8x64xf32>
    tpu.vector_store %arg9[%c0_60, %c192], %96 {strides = array<i32>} : memref<8x512xf32, #tpu.memory_space<vmem>>, vector<8x64xf32>,
    %c1_61 = arith.constant 1 : index
    %c0_62 = arith.constant 0 : index
    %c0_63 = arith.constant 0 : index
    %98 = vector.load %arg3[%c1_61, %c0_62, %c0_63] : memref<2x8x64xf32, #tpu.memory_space<vmem>>, vector<1x8x64xf32>
    %99 = vector.shape_cast %98 : vector<1x8x64xf32> to vector<8x64xf32>
    %c0_64 = arith.constant 0 : index
    %c256 = arith.constant 256 : index
    %100 = vector.load %arg9[%c0_64, %c256] : memref<8x512xf32, #tpu.memory_space<vmem>>, vector<8x64xf32>
    tpu.vector_store %arg9[%c0_64, %c256], %99 {strides = array<i32>} : memref<8x512xf32, #tpu.memory_space<vmem>>, vector<8x64xf32>,
    %cst_65 = arith.constant 0.000000e+00 : f32
    %101 = vector.broadcast %cst_65 : f32 to vector<8x64xf32>
    %c0_66 = arith.constant 0 : index
    %c320 = arith.constant 320 : index
    %102 = vector.load %arg9[%c0_66, %c320] : memref<8x512xf32, #tpu.memory_space<vmem>>, vector<8x64xf32>
    tpu.vector_store %arg9[%c0_66, %c320], %101 {strides = array<i32>} : memref<8x512xf32, #tpu.memory_space<vmem>>, vector<8x64xf32>,
    %103 = tpu.iota {dimensions = array<i32: 1>} : vector<8x256xi32>
    %c7_i32 = arith.constant 7 : i32
    %104 = vector.broadcast %c7_i32 : i32 to vector<8x256xi32>
    %105 = arith.andi %103, %104 : vector<8x256xi32>
    %c0_i32_67 = arith.constant 0 : i32
    %106 = vector.broadcast %c0_i32_67 : i32 to vector<8x256xi32>
    %107 = arith.cmpi eq, %105, %106 : vector<8x256xi32>
    %c7_i32_68 = arith.constant 7 : i32
    %108 = vector.broadcast %c7_i32_68 : i32 to vector<8x256xi32>
    %109 = arith.cmpi eq, %105, %108 : vector<8x256xi32>
    %c0_69 = arith.constant 0 : index
    %c119 = arith.constant 119 : index
    %110 = vector.load %arg9[%c0_69, %c119] : memref<8x512xf32, #tpu.memory_space<vmem>>, vector<8x256xf32>
    %cst_70 = arith.constant 0.000000e+00 : f32
    %111 = vector.broadcast %cst_70 : f32 to vector<8x256xf32>
    %112 = arith.select %107, %111, %110 : vector<8x256xi1>, vector<8x256xf32>
    %c0_71 = arith.constant 0 : index
    %c120 = arith.constant 120 : index
    %113 = vector.load %arg9[%c0_71, %c120] : memref<8x512xf32, #tpu.memory_space<vmem>>, vector<8x256xf32>
    %c0_72 = arith.constant 0 : index
    %c121 = arith.constant 121 : index
    %114 = vector.load %arg9[%c0_72, %c121] : memref<8x512xf32, #tpu.memory_space<vmem>>, vector<8x256xf32>
    %cst_73 = arith.constant 0.000000e+00 : f32
    %115 = vector.broadcast %cst_73 : f32 to vector<8x256xf32>
    %116 = arith.select %109, %115, %114 : vector<8x256xi1>, vector<8x256xf32>
    %c0_74 = arith.constant 0 : index
    %c127_75 = arith.constant 127 : index
    %117 = vector.load %arg9[%c0_74, %c127_75] : memref<8x512xf32, #tpu.memory_space<vmem>>, vector<8x256xf32>
    %cst_76 = arith.constant 0.000000e+00 : f32
    %118 = vector.broadcast %cst_76 : f32 to vector<8x256xf32>
    %119 = arith.select %107, %118, %117 : vector<8x256xi1>, vector<8x256xf32>
    %c0_77 = arith.constant 0 : index
    %c128_78 = arith.constant 128 : index
    %120 = vector.load %arg9[%c0_77, %c128_78] : memref<8x512xf32, #tpu.memory_space<vmem>>, vector<8x256xf32>
    %c0_79 = arith.constant 0 : index
    %c129_80 = arith.constant 129 : index
    %121 = vector.load %arg9[%c0_79, %c129_80] : memref<8x512xf32, #tpu.memory_space<vmem>>, vector<8x256xf32>
    %cst_81 = arith.constant 0.000000e+00 : f32
    %122 = vector.broadcast %cst_81 : f32 to vector<8x256xf32>
    %123 = arith.select %109, %122, %121 : vector<8x256xi1>, vector<8x256xf32>
    %c0_82 = arith.constant 0 : index
    %c135 = arith.constant 135 : index
    %124 = vector.load %arg9[%c0_82, %c135] : memref<8x512xf32, #tpu.memory_space<vmem>>, vector<8x256xf32>
    %cst_83 = arith.constant 0.000000e+00 : f32
    %125 = vector.broadcast %cst_83 : f32 to vector<8x256xf32>
    %126 = arith.select %107, %125, %124 : vector<8x256xi1>, vector<8x256xf32>
    %c0_84 = arith.constant 0 : index
    %c136 = arith.constant 136 : index
    %127 = vector.load %arg9[%c0_84, %c136] : memref<8x512xf32, #tpu.memory_space<vmem>>, vector<8x256xf32>
    %c0_85 = arith.constant 0 : index
    %c137 = arith.constant 137 : index
    %128 = vector.load %arg9[%c0_85, %c137] : memref<8x512xf32, #tpu.memory_space<vmem>>, vector<8x256xf32>
    %cst_86 = arith.constant 0.000000e+00 : f32
    %129 = vector.broadcast %cst_86 : f32 to vector<8x256xf32>
    %130 = arith.select %109, %129, %128 : vector<8x256xi1>, vector<8x256xf32>
    %131 = tpu.concatenate %112, %113, %116, %119, %120, %123, %126, %127, %130 in 0 : vector<8x256xf32>, vector<8x256xf32>, vector<8x256xf32>, vector<8x256xf32>, vector<8x256xf32>, vector<8x256xf32>, vector<8x256xf32>, vector<8x256xf32>, vector<8x256xf32> -> vector<72x256xf32>
    %c0_87 = arith.constant 0 : index
    %c0_88 = arith.constant 0 : index
    %132 = vector.load %arg5[%c0_87, %c0_88] : memref<8x72xf32, #tpu.memory_space<vmem>>, vector<8x72xf32>
    %cst_89 = arith.constant dense<0.000000e+00> : vector<8x256xf32>
    %133 = tpu.matmul %132, %131, %cst_89 {dimension_numbers = #tpu.dot_dimension_numbers<[1], [0], [0], [1], [0, 0, 1, 1], [], []>} : vector<8x72xf32>, vector<72x256xf32>, vector<8x256xf32> -> vector<8x256xf32>
    %134 = vector.extract_strided_slice %133 {offsets = [0, 0], sizes = [8, 64], strides = [1, 1]} : vector<8x256xf32> to vector<8x64xf32>
    %cst_90 = arith.constant dense<0.000000e+00> : vector<8xf32>
    %135 = vector.multi_reduction <add>, %134, %cst_90 [1] : vector<8x64xf32> to vector<8xf32>
    %136 = vector.shape_cast %135 : vector<8xf32> to vector<8x1xf32>
    %cst_91 = arith.constant 6.400000e+01 : f32
    %137 = vector.broadcast %cst_91 : f32 to vector<8x1xf32>
    %138 = arith.divf %136, %137 : vector<8x1xf32>
    %139 = vector.broadcast %138 : vector<8x1xf32> to vector<8x64xf32>
    %140 = arith.subf %134, %139 : vector<8x64xf32>
    %141 = arith.mulf %140, %140 : vector<8x64xf32>
    %cst_92 = arith.constant dense<0.000000e+00> : vector<8xf32>
    %142 = vector.multi_reduction <add>, %141, %cst_92 [1] : vector<8x64xf32> to vector<8xf32>
    %143 = vector.shape_cast %142 : vector<8xf32> to vector<8x1xf32>
    %cst_93 = arith.constant 6.400000e+01 : f32
    %144 = vector.broadcast %cst_93 : f32 to vector<8x1xf32>
    %145 = arith.divf %143, %144 : vector<8x1xf32>
    %cst_94 = arith.constant 9.99999974E-6 : f32
    %146 = vector.broadcast %cst_94 : f32 to vector<8x1xf32>
    %147 = arith.addf %145, %146 : vector<8x1xf32>
    %148 = math.rsqrt %147 : vector<8x1xf32>
    %149 = vector.broadcast %88 : f32 to vector<8x1xf32>
    %150 = arith.mulf %149, %148 : vector<8x1xf32>
    %151 = vector.broadcast %150 : vector<8x1xf32> to vector<8x64xf32>
    %152 = arith.mulf %140, %151 : vector<8x64xf32>
    %cst_95 = arith.constant 0.000000e+00 : f32
    %153 = vector.broadcast %cst_95 : f32 to vector<8x64xf32>
    %154 = arith.maximumf %152, %153 : vector<8x64xf32>
    %155 = vector.extract_strided_slice %133 {offsets = [0, 128], sizes = [8, 64], strides = [1, 1]} : vector<8x256xf32> to vector<8x64xf32>
    %cst_96 = arith.constant dense<0.000000e+00> : vector<8xf32>
    %156 = vector.multi_reduction <add>, %155, %cst_96 [1] : vector<8x64xf32> to vector<8xf32>
    %157 = vector.shape_cast %156 : vector<8xf32> to vector<8x1xf32>
    %cst_97 = arith.constant 6.400000e+01 : f32
    %158 = vector.broadcast %cst_97 : f32 to vector<8x1xf32>
    %159 = arith.divf %157, %158 : vector<8x1xf32>
    %160 = vector.broadcast %159 : vector<8x1xf32> to vector<8x64xf32>
    %161 = arith.subf %155, %160 : vector<8x64xf32>
    %162 = arith.mulf %161, %161 : vector<8x64xf32>
    %cst_98 = arith.constant dense<0.000000e+00> : vector<8xf32>
    %163 = vector.multi_reduction <add>, %162, %cst_98 [1] : vector<8x64xf32> to vector<8xf32>
    %164 = vector.shape_cast %163 : vector<8xf32> to vector<8x1xf32>
    %cst_99 = arith.constant 6.400000e+01 : f32
    %165 = vector.broadcast %cst_99 : f32 to vector<8x1xf32>
    %166 = arith.divf %164, %165 : vector<8x1xf32>
    %cst_100 = arith.constant 9.99999974E-6 : f32
    %167 = vector.broadcast %cst_100 : f32 to vector<8x1xf32>
    %168 = arith.addf %166, %167 : vector<8x1xf32>
    %169 = math.rsqrt %168 : vector<8x1xf32>
    %170 = vector.broadcast %88 : f32 to vector<8x1xf32>
    %171 = arith.mulf %170, %169 : vector<8x1xf32>
    %172 = vector.broadcast %171 : vector<8x1xf32> to vector<8x64xf32>
    %173 = arith.mulf %161, %172 : vector<8x64xf32>
    %cst_101 = arith.constant 0.000000e+00 : f32
    %174 = vector.broadcast %cst_101 : f32 to vector<8x64xf32>
    %175 = arith.maximumf %173, %174 : vector<8x64xf32>
    %c0_102 = arith.constant 0 : index
    %c0_103 = arith.constant 0 : index
    %176 = vector.load %arg6[%c0_102, %c0_103] : memref<64x256xf32, #tpu.memory_space<vmem>>, vector<64x256xf32>
    %cst_104 = arith.constant dense<0.000000e+00> : vector<8x256xf32>
    %177 = tpu.matmul %154, %176, %cst_104 {dimension_numbers = #tpu.dot_dimension_numbers<[1], [0], [0], [1], [0, 0, 1, 1], [], []>} : vector<8x64xf32>, vector<64x256xf32>, vector<8x256xf32> -> vector<8x256xf32>
    %178 = arith.addf %66, %177 : vector<8x256xf32>
    %c0_105 = arith.constant 0 : index
    %c0_106 = arith.constant 0 : index
    %c0_107 = arith.constant 0 : index
    %179 = vector.load %arg7[%c0_105, %c0_106, %c0_107] : memref<2x8x256xf32, #tpu.memory_space<vmem>>, vector<1x8x256xf32>
    %180 = vector.shape_cast %179 : vector<1x8x256xf32> to vector<8x256xf32>
    %181 = vector.shape_cast %178 : vector<8x256xf32> to vector<1x8x256xf32>
    tpu.vector_store %arg7[%c0_105, %c0_106, %c0_107], %181 {strides = array<i32>} : memref<2x8x256xf32, #tpu.memory_space<vmem>>, vector<1x8x256xf32>,
    %cst_108 = arith.constant dense<0.000000e+00> : vector<8x256xf32>
    %182 = tpu.matmul %175, %176, %cst_108 {dimension_numbers = #tpu.dot_dimension_numbers<[1], [0], [0], [1], [0, 0, 1, 1], [], []>} : vector<8x64xf32>, vector<64x256xf32>, vector<8x256xf32> -> vector<8x256xf32>
    %183 = arith.addf %87, %182 : vector<8x256xf32>
    %c1_109 = arith.constant 1 : index
    %c0_110 = arith.constant 0 : index
    %c0_111 = arith.constant 0 : index
    %184 = vector.load %arg7[%c1_109, %c0_110, %c0_111] : memref<2x8x256xf32, #tpu.memory_space<vmem>>, vector<1x8x256xf32>
    %185 = vector.shape_cast %184 : vector<1x8x256xf32> to vector<8x256xf32>
    %186 = vector.shape_cast %183 : vector<8x256xf32> to vector<1x8x256xf32>
    tpu.vector_store %arg7[%c1_109, %c0_110, %c0_111], %186 {strides = array<i32>} : memref<2x8x256xf32, #tpu.memory_space<vmem>>, vector<1x8x256xf32>,
    return
  }
  func.func @transform_0(%arg0: i32) -> i32 {
    %c0_i32 = arith.constant 0 : i32
    %c0_i32_0 = arith.constant 0 : i32
    return %c0_i32 : i32
  }
  func.func @transform_1(%arg0: i32) -> (i32, i32, i32) {
    %c0_i32 = arith.constant 0 : i32
    %c0_i32_0 = arith.constant 0 : i32
    %c0_i32_1 = arith.constant 0 : i32
    return %arg0, %c0_i32, %c0_i32_0 : i32, i32, i32
  }
  func.func @transform_2(%arg0: i32) -> (i32, i32, i32) {
    %c0_i32 = arith.constant 0 : i32
    %c0_i32_0 = arith.constant 0 : i32
    %c0_i32_1 = arith.constant 0 : i32
    return %arg0, %c0_i32, %c0_i32_0 : i32, i32, i32
  }
  func.func @transform_3(%arg0: i32) -> (i32, i32) {
    %c0_i32 = arith.constant 0 : i32
    %c0_i32_0 = arith.constant 0 : i32
    %c0_i32_1 = arith.constant 0 : i32
    return %c0_i32, %c0_i32_0 : i32, i32
  }
  func.func @transform_4(%arg0: i32) -> (i32, i32) {
    %c0_i32 = arith.constant 0 : i32
    %c0_i32_0 = arith.constant 0 : i32
    %c0_i32_1 = arith.constant 0 : i32
    return %c0_i32, %c0_i32_0 : i32, i32
  }
  func.func @transform_5(%arg0: i32) -> (i32, i32) {
    %c0_i32 = arith.constant 0 : i32
    %c0_i32_0 = arith.constant 0 : i32
    %c0_i32_1 = arith.constant 0 : i32
    return %c0_i32, %c0_i32_0 : i32, i32
  }
  func.func @transform_6(%arg0: i32) -> (i32, i32, i32) {
    %c0_i32 = arith.constant 0 : i32
    %c0_i32_0 = arith.constant 0 : i32
    %c0_i32_1 = arith.constant 0 : i32
    return %arg0, %c0_i32, %c0_i32_0 : i32, i32, i32
  }
}

</mosaic_0001>

<bundles_post_ra>
// kernel: refine_block_forward.1
= control target key start
LH: loop header
LB: loop body
LE: loop exit
PB: predicated region body
PF: predicated region fallthrough
CT: control target
= control target key end

     0   :  { %11 = vsyncpa [#allocation5], 0  ;;  %s1644_s21 = smov 0   ;;  %s2239_s0 = inlined_call_operand.vmem [shape: f32[2], index: 0, kind: input, shape index: {}]   ;;  %s2240_s1 = inlined_call_operand.vmem [shape: f32[4,8,256], index: 1, kind: input, shape index: {}]   ;;  %s2241_s2 = inlined_call_operand.vmem [shape: f32[4,8,64], index: 2, kind: input, shape index: {}]   ;;  %s2242_s3 = inlined_call_operand.vmem [shape: f32[8,72], index: 3, kind: input, shape index: {}]   ;;  %s2243_s4 = inlined_call_operand.vmem [shape: f32[8,72], index: 4, kind: input, shape index: {}]   ;;  %s2244_s5 = inlined_call_operand.vmem [shape: f32[64,256], index: 5, kind: input, shape index: {}]   ;;  %s2245_s6 = inlined_call_operand.vmem [shape: f32[4,8,256], index: 6, kind: output, shape index: {}]  }
   0x1 LB: > { %s1361_s22 = sadd.s32 4294967295, %s1591_s21   ;;  %p1363_p0 = scmp.ge.s32.totalorder %s1591_s21, 1  ;;  %s1591_s21 = sphi %s1644_s21, %s17_s21  }
   0x2   : > { %p184_p1 = scmp.lt.s32.totalorder %s1591_s21, 3  ;;  %s197_s25 = sshll.u32 %s2239_s0, 4  ;;  %s198_s25 = int_to_ptr.vmem [resolvable:$true] %s197_s25 }
   0x3   : > { %p1659_p3 = scmp.eq.s32.totalorder %s1361_s22, 0  ;;  %s1566_s28 = scalar_lea.vmem %s198_s25, 16 }
   0x4   : > { %p1655_p2 = pnand %p1363_p0, %p184_p1  ;;  %p1567_p6 = scmp.ne.s32.totalorder %s198_s25, %s1566_s28 }
   0x5   : > { %p1574_p10 = scmp.lt.s32.totalorder %s198_s25, %s198_s25  ;;  %p1575_p11 = scmp.lt.s32.totalorder %s1566_s28, %s1566_s28 }
   0x6   : > { %p1508_p4 = pneg %p1655_p2 }
   0x7   : > { %p1576_p12 = por %p1575_p11, %p1574_p10 }
   0x8   : > { %p1509_p5 = pnand %p1659_p3, %p1508_p4 }
   0xa   : > { %p1568_p7 = pneg %p1509_p5 }
   0xc   : > { %p1569_p8 = pnand %p1568_p7, %p1567_p6 }
   0xe   : > { %p1570_p9 = pneg %p1569_p8 }
  0x10   : > { %p1577_p13 = pnand %p1576_p12, %p1570_p9 }
  0x12   : > { %1580 = shalt.err (!%p1577_p13)
}
  0x13   : > { %s1593_s29 = smov [#allocation4]   ;;  %238 = sbr.rel (%p1655_p2) target bundleno = 947 (0x3b3), region = 44 }
  0x14   : > { %1511 = dma.vmem_to_smem (!%p1509_p5), %s198_s25, 16, %s1593_s29, [#allocation5]  }
  0x18   : > { %1586 = dma.done.wait (%p1659_p3), [#allocation5], 16  }
  0x19   : > { %1588 = vsyncadd (%p1659_p3), [#allocation5], 4294967280 }
  0x1a   : > { %244 = sfence }
  0x1b   : > { %v1594_v0 = vmov 0.0   ;;  %s1595_s30 = smov 111   ;;  %s1368_s7 = sshll.u32 %s1361_s22, 1  ;;  %vm2246_vm0 = vcmask 523264   ;;  %vm877_vm1 = vcmask 1048064   ;;  %v310_v9 = vlaneseq  ;;  %v1954_v62 = vld [vmem:[%s2242_s3] sm:$0xff] }
  0x1c   : > { %532 = vrot.lane.b32.xlu1 %v1594_v0, %s1595_s30  ;;  %755 = vmatprep.mubr.f32.mxu1 %v1594_v0  ;;  %p277_p0 = scmp.lt.s32.totalorder %s1368_s7, 3  ;;  %s1596_s8 = smov 112   ;;  %vm542_vm2 = vcmask 908288   ;;  %vm602_vm5 = vcmask 916480   ;;  %vm509_vm6 = vcmask 924672   ;;  %vm476_vm9 = vcmask 1039360  }
  0x1d   : > { %684 = vmatprep.mubr.f32.mxu0 %v1594_v0  ;;  %s1597_s17 = smov 113   ;;  %s1598_s18 = smov 127   ;;  %v1803_v10 = vand.u32 127, %v310_v9  ;;  %vm429_vm10 = vcmask 7168   ;;  %vm396_vm11 = vcmask 121856   ;;  %vm575_vm12 = vcmask 130048  }
  0x1e   : > { %s2288_s7 = smov (!%p277_p0, %s1368_s7), 3  ;;  %s1599_s19 = smov 1   ;;  %vm363_vm13 = vcmask 138240   ;;  %vm616_vm14 = vcmask 588800   ;;  %vm970_vm15 = vcmask 973824  }
  0x1f   : > { %s1486_s9 = sshll.u32 %s2288_s7, 4  ;;  %s1372_s10 = sshll.u32 %s2288_s7, 3  ;;  %v314_v12 = vadd.s32 384, %v1803_v10  ;;  %v313_v14 = vadd.s32 256, %v1803_v10  ;;  %v1940_v54 = vadd.s32 128, %v1803_v10 }
  0x20   : > { %592 = vrot.lane.b32.xlu1 %v1594_v0, %s1596_s8  ;;  %s1688_s13 = scalar_lea.vmem %s2240_s1, %s1486_s9  ;;  %s287_s16 = scalar_lea.vmem %s2241_s2, %s1372_s10 }
  0x21   : > { %v1694_v1 = vld [vmem:[%s1688_s13 + $0x10] sm:$0xff]  ;;  %v874_v2 = vld [vmem:[%s287_s16] sm:$0xff]  ;;  %v1454_v3 = vld [vmem:[%s287_s16 + $0x8] sm:$0xff]  ;;  %s1600_s20 = smov 15   ;;  %s1601_s22 = smov 16   ;;  %v320_v15 = vand.u32 15, %v314_v12 }
  0x22   : > { %876 = vst.msk [vmem:[#allocation3 + $0x8] sm:$0xff] %vm2246_vm0, %v874_v2  ;;  %881 = vst.msk [vmem:[#allocation3 + $0x10] sm:$0xff] %vm2246_vm0, %v1454_v3  ;;  %534 = vrot.lane.b32.xlu0 %v1694_v1, %s1595_s30  ;;  %v1705_v4 = vld [vmem:[%s1688_s13 + $0x18] sm:$0xff]  ;;  %v1728_v5 = vld [vmem:[%s1688_s13 + $0x8] sm:$0xff]  ;;  %s1602_s23 = smov 17   ;;  %s1603_s24 = smov 119  }
  0x23   : > { %878 = vst.msk [vmem:[#allocation3 + $0x8] sm:$0xff] %vm877_vm1, %v1594_v0  ;;  %882 = vst.msk [vmem:[#allocation3 + $0x10] sm:$0xff] %vm877_vm1, %v1594_v0  ;;  %s1604_s25 = smov 120   ;;  %s1605_s26 = smov 121   ;;  %v1783_v8 = vld [vmem:[%s1688_s13] sm:$0xff]  ;;  %v319_v18 = vand.u32 15, %v313_v14 }
  0x24   : > { %594 = vrot.lane.b32.xlu1 %v1694_v1, %s1596_s8  ;;  %s1606_s27 = smov 7   ;;  %s1607_s28 = smov 8   ;;  %vm1823_vm3 = vcmp.ne.s32.totalorder %v320_v15, 15  ;;  %vm1857_vm7 = vcmp.ne.s32.totalorder %v320_v15, 0  ;;  %v884_v58 = vand.u32 7, %v1940_v54  ;;  %v883_v2 = vand.u32 7, %v1803_v10 }
  0x25   : > { %s1608_s29 = smov 9   ;;  %vm1831_vm4 = vcmp.ne.s32.totalorder %v319_v18, 15  ;;  %vm1869_vm8 = vcmp.ne.s32.totalorder %v319_v18, 0  ;;  %vm901_vm0 = vcmask 72704   ;;  %v999_v14 = vld [vmem:[%s2243_s4] sm:$0xff] }
  0x26   : > { %536 = vrot.lane.b32.xlu0 %v1705_v4, %s1595_s30  ;;  %vm1962_vm1 = vcmp.ne.s32.totalorder %v884_v58, 7 }
  0x28   : > { %503 = vrot.lane.b32.xlu1 %v1705_v4, %s1597_s17 }
  0x2a   : > { %596 = vrot.lane.b32.xlu0 %v1705_v4, %s1596_s8  ;;  %v1749_v6 = vld [vmem:[#allocation3 + $0x10] sm:$0xff]  ;;  %v1754_v7 = vld [vmem:[#allocation3 + $0x8] sm:$0xff] }
  0x2c   : > { %468 = vrot.lane.b32.xlu1 %v1694_v1, %s1598_s18 }
  0x2e   : > { %501 = vrot.lane.b32.xlu0 %v1694_v1, %s1597_s17 }
  0x30   : > { %466 = vrot.lane.b32.xlu1 %v1594_v0, %s1598_s18 }
  0x32   : > { %499 = vrot.lane.b32.xlu0 %v1594_v0, %s1597_s17 }
  0x34   : > { %423 = vrot.lane.b32.xlu1 %v1694_v1, %s1599_s19 }
  0x36   : > { %470 = vrot.lane.b32.xlu0 %v1705_v4, %s1598_s18 }
  0x38   : > { %388 = vrot.lane.b32.xlu1 %v1594_v0, %s1600_s20 }
  0x3a   : > { %421 = vrot.lane.b32.xlu0 %v1594_v0, %s1599_s19 }
  0x3c   : > { %386 = vrot.lane.b32.xlu1 %v1728_v5, %s1600_s20 }
  0x3e   : > { %419 = vrot.lane.b32.xlu0 %v1728_v5, %s1599_s19 }
  0x40   : > { %569 = vrot.lane.b32.xlu1 %v1694_v1, %s1601_s22 }
  0x42   : > { %390 = vrot.lane.b32.xlu0 %v1694_v1, %s1600_s20 }
  0x44   : > { %355 = vrot.lane.b32.xlu1 %v1594_v0, %s1602_s23 }
  0x46   : > { %567 = vrot.lane.b32.xlu0 %v1594_v0, %s1601_s22 }
  0x48   : > { %353 = vrot.lane.b32.xlu1 %v1728_v5, %s1602_s23 }
  0x4a   : > { %565 = vrot.lane.b32.xlu0 %v1728_v5, %s1601_s22 }
  0x4c   : > { %968 = vrot.lane.b32.xlu1 %v1594_v0, %s1603_s24 }
  0x4e   : > { %357 = vrot.lane.b32.xlu0 %v1694_v1, %s1602_s23 }
  0x50   : > { %990 = vrot.lane.b32.xlu1 %v1749_v6, %s1604_s25 }
  0x52   : > { %966 = vrot.lane.b32.xlu0 %v1749_v6, %s1603_s24 }
  0x54   : > { %988 = vrot.lane.b32.xlu1 %v1754_v7, %s1604_s25 }
  0x56   : > { %964 = vrot.lane.b32.xlu0 %v1754_v7, %s1603_s24  ;;  %s1453_s24 = sld [smem:[#allocation4 + $0x1]] }
  0x58   : > { %955 = vrot.lane.b32.xlu1 %v1594_v0, %s1605_s26 }
  0x5a   : > { %992 = vrot.lane.b32.xlu0 %v1594_v0, %s1604_s25  ;;  %s296_s25 = sld [smem:[#allocation4]] }
  0x5c   : > { %941 = vrot.lane.b32.xlu1 %v1749_v6, %s1598_s18 }
  0x5e   : > { %953 = vrot.lane.b32.xlu0 %v1749_v6, %s1605_s26 }
  0x60   : > { %939 = vrot.lane.b32.xlu1 %v1754_v7, %s1598_s18 }
  0x62   : > { %951 = vrot.lane.b32.xlu0 %v1754_v7, %s1605_s26 }
  0x64   : > { %925 = vrot.lane.b32.xlu1 %v1749_v6, %s1599_s19 }
  0x66   : > { %943 = vrot.lane.b32.xlu0 %v1594_v0, %s1598_s18 }
  0x68   : > { %910 = vrot.lane.b32.xlu1 %v1754_v7, %s1606_s27 }
  0x6a   : > { %923 = vrot.lane.b32.xlu0 %v1754_v7, %s1599_s19 }
  0x6c   : > { %908 = vrot.lane.b32.xlu1 %v1594_v0, %s1606_s27 }
  0x6e   : > { %921 = vrot.lane.b32.xlu0 %v1594_v0, %s1599_s19 }
  0x70   : > { %981 = vrot.lane.b32.xlu1 %v1749_v6, %s1607_s28 }
  0x72   : > { %912 = vrot.lane.b32.xlu0 %v1749_v6, %s1606_s27 }
  0x74   : > { %897 = vrot.lane.b32.xlu1 %v1754_v7, %s1608_s29 }
  0x76   : > { %979 = vrot.lane.b32.xlu0 %v1754_v7, %s1607_s28 }
  0x78   : > { %895 = vrot.lane.b32.xlu1 %v1594_v0, %s1608_s29 }
  0x7a   : > { %977 = vrot.lane.b32.xlu0 %v1594_v0, %s1607_s28  ;;  %s294_s28 = scalar_lea.vmem %s2245_s6, %s1486_s9 }
  0x7c   : > { %528 = vrot.lane.b32.xlu1 %v1783_v8, %s1595_s30 }
  0x7e   : > { %899 = vrot.lane.b32.xlu0 %v1749_v6, %s1608_s29 }
  0x80   : > { %588 = vrot.lane.b32.xlu1 %v1783_v8, %s1596_s8 }
  0x82   : > { %530 = vrot.lane.b32.xlu0 %v1728_v5, %s1595_s30 }
  0x84   : > { %495 = vrot.lane.b32.xlu1 %v1783_v8, %s1597_s17 }
  0x86   : > { %590 = vrot.lane.b32.xlu0 %v1728_v5, %s1596_s8 }
  0x88   : > { %462 = vrot.lane.b32.xlu1 %v1783_v8, %s1598_s18 }
  0x8a   : > { %497 = vrot.lane.b32.xlu0 %v1728_v5, %s1597_s17 }
  0x8c   : > { %415 = vrot.lane.b32.xlu1 %v1594_v0, %s1599_s19 }
  0x8e   : > { %v1805_v11 = vpop.permute.xlu1 %532  ;;  %464 = vrot.lane.b32.xlu0 %v1728_v5, %s1598_s18 }
  0x90   : > { %382 = vrot.lane.b32.xlu1 %v1594_v0, %s1600_s20 }
  0x92   : > { %v1812_v13 = vpop.permute.xlu1 %592  ;;  %417 = vrot.lane.b32.xlu0 %v1783_v8, %s1599_s19 }
  0x94   : > { %561 = vrot.lane.b32.xlu1 %v1594_v0, %s1601_s22  ;;  %v535_v16 = vpop.permute.xlu0 %534 }
  0x95   : > { %v545_v24 = vsel %vm542_vm2, %v1805_v11, %v535_v16 }
  0x96   : > { %v595_v17 = vpop.permute.xlu1 %594  ;;  %384 = vrot.lane.b32.xlu0 %v1783_v8, %s1600_s20 }
  0x97   : > { %v605_v28 = vsel %vm602_vm5, %v1812_v13, %v595_v17 }
  0x98   : > { %349 = vrot.lane.b32.xlu1 %v1594_v0, %s1602_s23  ;;  %v1827_v20 = vpop.permute.xlu0 %536 }
  0x99   : > { %v546_v23 = vsel %vm542_vm2, %v535_v16, %v1827_v20 }
  0x9a   : > { %v1829_v21 = vpop.permute.xlu1 %503  ;;  %1404 = vmatprep.subr.msk.mxu1 %vm1823_vm3, %v546_v23  ;;  %563 = vrot.lane.b32.xlu0 %v1783_v8, %s1601_s22 }
  0x9b   : > { %1406 = vmatpush1.msk.msra.mxu1 %vm1831_vm4, %v545_v24 }
  0x9c   : > { %1544 = vrot.lane.b32.xlu1 %v1594_v0, %s1596_s8  ;;  %v1847_v25 = vpop.permute.xlu0 %596 }
  0x9d   : > { %v606_v27 = vsel %vm602_vm5, %v595_v17, %v1847_v25 }
  0x9e   : > { %v469_v26 = vpop.permute.xlu1 %468  ;;  %707 = vmatprep.subr.mxu1 %v606_v27  ;;  %351 = vrot.lane.b32.xlu0 %v1783_v8, %s1602_s23 }
  0x9f   : > { %708 = vmatpush1.msra.mxu1 %v605_v28 }
  0xa0   : > { %1554 = vrot.lane.b32.xlu1 %v1594_v0, %s1598_s18  ;;  %v502_v30 = vpop.permute.xlu0 %501 }
  0xa1   : > { %v513_v32 = vsel %vm509_vm6, %v502_v30, %v1829_v21 }
  0xa2   : > { %v1861_v31 = vpop.permute.xlu1 %466  ;;  %1408 = vmatprep.subr.msk.mxu1 %vm1857_vm7, %v513_v32  ;;  %1539 = vrot.lane.b32.xlu0 %v1594_v0, %s1595_s30 }
  0xa3   : > { %v479_v40 = vsel %vm476_vm9, %v1861_v31, %v469_v26 }
  0xa4   : > { %427 = vrot.lane.b32.xlu1 %v1594_v0, %s1599_s19  ;;  %v1875_v34 = vpop.permute.xlu0 %499 }
  0xa5   : > { %v512_v36 = vsel %vm509_vm6, %v1875_v34, %v502_v30 }
  0xa6   : > { %v1877_v35 = vpop.permute.xlu1 %423  ;;  %1410 = vmatpush1.msk.msra.mxu1 %vm1869_vm8, %v512_v36  ;;  %1549 = vrot.lane.b32.xlu0 %v1594_v0, %s1597_s17 }
  0xa8   : > { %394 = vrot.lane.b32.xlu1 %v1594_v0, %s1600_s20  ;;  %v1887_v37 = vpop.permute.xlu0 %470 }
  0xa9   : > { %v480_v39 = vsel %vm476_vm9, %v469_v26, %v1887_v37 }
  0xaa   : > { %v389_v38 = vpop.permute.xlu1 %388  ;;  %1412 = vmatprep.subr.msk.mxu1 %vm1823_vm3, %v480_v39  ;;  %425 = vrot.lane.b32.xlu0 %v1705_v4, %s1599_s19 }
  0xab   : > { %1414 = vmatpush1.msk.msra.mxu1 %vm1831_vm4, %v479_v40 }
  0xac   : > { %573 = vrot.lane.b32.xlu1 %v1594_v0, %s1601_s22  ;;  %713 = vmatprep.subr.mxu1 %v1694_v1  ;;  %v422_v41 = vpop.permute.xlu0 %421  ;;  %v317_v1 = vand.u32 15, %v1803_v10 }
  0xad   : > { %v433_v43 = vsel %vm429_vm10, %v422_v41, %v1877_v35  ;;  %714 = vmatpush1.msra.mxu1 %v1594_v0 }
  0xae   : > { %v1902_v42 = vpop.permute.xlu1 %386  ;;  %1416 = vmatprep.subr.msk.mxu1 %vm1857_vm7, %v433_v43  ;;  %392 = vrot.lane.b32.xlu0 %v1705_v4, %s1600_s20 }
  0xaf   : > { %v399_v50 = vsel %vm396_vm11, %v1902_v42, %v389_v38 }
  0xb0   : > { %361 = vrot.lane.b32.xlu1 %v1594_v0, %s1602_s23  ;;  %v1913_v44 = vpop.permute.xlu0 %419 }
  0xb1   : > { %v432_v46 = vsel %vm429_vm10, %v1913_v44, %v422_v41 }
  0xb2   : > { %v1915_v45 = vpop.permute.xlu1 %569  ;;  %1418 = vmatpush1.msk.msra.mxu1 %vm1869_vm8, %v432_v46  ;;  %571 = vrot.lane.b32.xlu0 %v1705_v4, %s1601_s22 }
  0xb4   : > { %v1923_v47 = vpop.permute.xlu0 %390 }
  0xb5   : > { %v400_v49 = vsel %vm396_vm11, %v389_v38, %v1923_v47 }
  0xb6   : > { %v356_v48 = vpop.permute.xlu1 %355  ;;  %1420 = vmatprep.subr.msk.mxu1 %vm1823_vm3, %v400_v49  ;;  %359 = vrot.lane.b32.xlu0 %v1705_v4, %s1602_s23  ;;  %vm1972_vm3 = vcmp.ne.s32.totalorder %v883_v2, 7 }
  0xb7   : > { %1422 = vmatpush1.msk.msra.mxu1 %vm1831_vm4, %v399_v50  ;;  %vm994_vm4 = vcmask 982016  }
  0xb8   : > { %v568_v51 = vpop.permute.xlu0 %567 }
  0xb9   : > { %v579_v53 = vsel %vm575_vm12, %v568_v51, %v1915_v45 }
  0xba   : > { %v1935_v52 = vpop.permute.xlu1 %353  ;;  %719 = vmatprep.subr.mxu1 %v579_v53 }
  0xbb   : > { %v366_v63 = vsel %vm363_vm13, %v1935_v52, %v356_v48 }
  0xbc   : > { %v1942_v55 = vpop.permute.xlu0 %565 }
  0xbd   : > { %v578_v57 = vsel %vm575_vm12, %v1942_v55, %v568_v51 }
  0xbe   : > { %v969_v56 = vpop.permute.xlu1 %968  ;;  %720 = vmatpush1.msra.mxu1 %v578_v57 }
  0xc0   : > { %v1947_v59 = vpop.permute.xlu0 %357 }
  0xc1   : > { %v367_v61 = vsel %vm363_vm13, %v356_v48, %v1947_v59 }
  0xc2   : > { %v991_v60 = vpop.permute.xlu1 %990  ;;  %1424 = vmatprep.subr.msk.mxu1 %vm1857_vm7, %v367_v61  ;;  %vm957_vm7 = vcmask 990208  }
  0xc3   : > { %1426 = vmatpush1.msk.msra.mxu1 %vm1869_vm8, %v366_v63  ;;  %vm1978_vm8 = vcmp.ne.s32.totalorder %v884_v58, 0 }
  0xc4   : > { %v967_v3 = vpop.permute.xlu0 %966  ;;  %1427 = vmatmul.mubr.msk.f32.vlgmr.msra.gmra.mxu1 %vm616_vm14, %v1954_v62 }
  0xc5   : > { %v972_v12 = vsel %vm970_vm15, %v967_v3, %v969_v56  ;;  %1067 = vmatprep.mubr.f32.mxu1 %v1594_v0 }
  0xc6   : > { %v989_v9 = vpop.permute.xlu1 %988  ;;  %1456 = vmatprep.subr.msk.mxu1 %vm1962_vm1, %v972_v12 }
  0xc7   : > { %v995_v23 = vsel %vm994_vm4, %v989_v9, %v991_v60 }
  0xc8   : > { %v965_v15 = vpop.permute.xlu0 %964 }
  0xc9   : > { %v971_v17 = vsel %vm970_vm15, %v965_v15, %v967_v3  ;;  %vm1984_vm15 = vcmp.ne.s32.totalorder %v883_v2, 0  ;;  %v318_v2 = vand.u32 15, %v1940_v54 }
  0xca   : > { %v956_v16 = vpop.permute.xlu1 %955  ;;  %1458 = vmatpush1.msk.msra.mxu1 %vm1972_vm3, %v971_v17 }
  0xcc   : > { %v993_v18 = vpop.permute.xlu0 %992 }
  0xcd   : > { %v996_v22 = vsel %vm994_vm4, %v991_v60, %v993_v18  ;;  %vm914_vm4 = vcmask 56320  }
  0xce   : > { %v942_v19 = vpop.permute.xlu1 %941  ;;  %1019 = vmatprep.subr.mxu1 %v996_v22 }
  0xcf   : > { %1020 = vmatpush1.msra.mxu1 %v995_v23 }
  0xd0   : > { %v954_v26 = vpop.permute.xlu0 %953 }
  0xd1   : > { %v959_v28 = vsel %vm957_vm7, %v954_v26, %v956_v16 }
  0xd2   : > { %v940_v27 = vpop.permute.xlu1 %939  ;;  %1460 = vmatprep.subr.msk.mxu1 %vm1978_vm8, %v959_v28 }
  0xd3   : > { %v945_v40 = vsel %vm476_vm9, %v940_v27, %v942_v19 }
  0xd4   : > { %v952_v30 = vpop.permute.xlu0 %951 }
  0xd5   : > { %v958_v33 = vsel %vm957_vm7, %v952_v30, %v954_v26  ;;  %vm983_vm7 = vcmask 64512  }
  0xd6   : > { %v926_v32 = vpop.permute.xlu1 %925  ;;  %1462 = vmatpush1.msk.msra.mxu1 %vm1984_vm15, %v958_v33 }
  0xd8   : > { %v944_v36 = vpop.permute.xlu0 %943 }
  0xd9   : > { %v946_v39 = vsel %vm476_vm9, %v942_v19, %v944_v36 }
  0xda   : > { %v911_v38 = vpop.permute.xlu1 %910  ;;  %1464 = vmatprep.subr.msk.mxu1 %vm1962_vm1, %v946_v39 }
  0xdb   : > { %1466 = vmatpush1.msk.msra.mxu1 %vm1972_vm3, %v945_v40 }
  0xdc   : > { %1025 = vmatprep.subr.mxu1 %v1749_v6  ;;  %v924_v41 = vpop.permute.xlu0 %923 }
  0xdd   : > { %v928_v46 = vsel %vm429_vm10, %v924_v41, %v926_v32  ;;  %1026 = vmatpush1.msra.mxu1 %v1754_v7 }
  0xde   : > { %v909_v43 = vpop.permute.xlu1 %908  ;;  %1468 = vmatprep.subr.msk.mxu1 %vm1978_vm8, %v928_v46 }
  0xdf   : > { %v915_v56 = vsel %vm914_vm4, %v909_v43, %v911_v38 }
  0xe0   : > { %v922_v48 = vpop.permute.xlu0 %921 }
  0xe1   : > { %v927_v50 = vsel %vm429_vm10, %v922_v48, %v924_v41 }
  0xe2   : > { %v982_v49 = vpop.permute.xlu1 %981  ;;  %1470 = vmatpush1.msk.msra.mxu1 %vm1984_vm15, %v927_v50 }
  0xe4   : > { %v913_v51 = vpop.permute.xlu0 %912 }
  0xe5   : > { %v916_v6 = vsel %vm914_vm4, %v911_v38, %v913_v51  ;;  %v316_v51 = vadd.s32 640, %v1803_v10 }
  0xe6   : > { %v898_v53 = vpop.permute.xlu1 %897  ;;  %1472 = vmatprep.subr.msk.mxu1 %vm1962_vm1, %v916_v6  ;;  %vm2017_vm1 = vcmp.ne.s32.totalorder %v318_v2, 15 }
  0xe7   : > { %1474 = vmatpush1.msk.msra.mxu1 %vm1972_vm3, %v915_v56  ;;  %vm2022_vm3 = vcmp.ne.s32.totalorder %v317_v1, 15 }
  0xe8   : > { %v980_v7 = vpop.permute.xlu0 %979 }
  0xe9   : > { %v985_v58 = vsel %vm983_vm7, %v980_v7, %v982_v49 }
  0xea   : > { %v896_v57 = vpop.permute.xlu1 %895  ;;  %1031 = vmatprep.subr.mxu1 %v985_v58 }
  0xeb   : > { %v902_v15 = vsel %vm901_vm0, %v896_v57, %v898_v53  ;;  %v322_v57 = vand.u32 15, %v316_v51 }
  0xec   : > { %v978_v60 = vpop.permute.xlu0 %977 }
  0xed   : > { %v984_v63 = vsel %vm983_vm7, %v978_v60, %v980_v7  ;;  %vm2106_vm7 = vcmp.ne.s32.totalorder %v322_v57, 0 }
  0xee   : > { %v529_v61 = vpop.permute.xlu1 %528  ;;  %1032 = vmatpush1.msra.mxu1 %v984_v63 }
  0xf0   : > { %v900_v3 = vpop.permute.xlu0 %899 }
  0xf1   : > { %v903_v12 = vsel %vm901_vm0, %v898_v53, %v900_v3  ;;  %vm2037_vm0 = vcmp.ne.s32.totalorder %v318_v2, 0  ;;  %v315_v53 = vadd.s32 512, %v1803_v10  ;;  %v1112_v2 = vld [vmem:[%s2244_s5 + $0x30] sm:$0xff]  ;;  %v1110_v3 = vld [vmem:[%s2244_s5 + $0x20] sm:$0xff] }
  0xf2   : > { %v589_v9 = vpop.permute.xlu1 %588  ;;  %1476 = vmatprep.subr.msk.mxu1 %vm1978_vm8, %v903_v12  ;;  %vm2041_vm8 = vcmp.ne.s32.totalorder %v317_v1, 0 }
  0xf3   : > { %1478 = vmatpush1.msk.msra.mxu1 %vm1984_vm15, %v902_v15  ;;  %vm2089_vm15 = vcmp.ne.s32.totalorder %v322_v57, 15  ;;  %v1119_v57 = vld [vmem:[%s2244_s5 + $0x68] sm:$0xff] }
  0xf4   : > { %1479 = vmatmul.mubr.msk.f32.vlgmr.msra.gmra.mxu1 %vm616_vm14, %v999_v14  ;;  %v531_v54 = vpop.permute.xlu0 %530 }
  0xf5   : > { %v544_v19 = vsel %vm542_vm2, %v531_v54, %v1805_v11  ;;  %v543_v22 = vsel %vm542_vm2, %v529_v61, %v531_v54  ;;  %1267 = vmatprep.mubr.f32.mxu1 %v1594_v0 }
  0xf6   : > { %v496_v17 = vpop.permute.xlu1 %495  ;;  %1379 = vmatprep.subr.msk.mxu0 %vm2017_vm1, %v544_v19 }
  0xf7   : > { %1381 = vmatpush1.msk.msra.mxu0 %vm2022_vm3, %v543_v22 }
  0xf8   : > { %v591_v23 = vpop.permute.xlu0 %590 }
  0xf9   : > { %v604_v26 = vsel %vm602_vm5, %v591_v23, %v1812_v13  ;;  %v603_v27 = vsel %vm602_vm5, %v589_v9, %v591_v23 }
  0xfa   : > { %v463_v24 = vpop.permute.xlu1 %462  ;;  %636 = vmatprep.subr.mxu0 %v604_v26 }
  0xfb   : > { %637 = vmatpush1.msra.mxu0 %v603_v27 }
  0xfc   : > { %v498_v28 = vpop.permute.xlu0 %497 }
  0xfd   : > { %v510_v32 = vsel %vm509_vm6, %v496_v17, %v498_v28  ;;  %v511_v33 = vsel %vm509_vm6, %v498_v28, %v1875_v34 }
  0xfe   : > { %v416_v29 = vpop.permute.xlu1 %415  ;;  %1383 = vmatprep.subr.msk.mxu0 %vm2037_vm0, %v511_v33 }
  0xff   : > { %1385 = vmatpush1.msk.msra.mxu0 %vm2041_vm8, %v510_v32 }
 0x100   : > { %v465_v13 = vpop.permute.xlu0 %464 }
 0x101   : > { %v477_v38 = vsel %vm476_vm9, %v463_v24, %v465_v13  ;;  %v478_v39 = vsel %vm476_vm9, %v465_v13, %v1861_v31 }
 0x102   : > { %v383_v36 = vpop.permute.xlu1 %382  ;;  %1387 = vmatprep.subr.msk.mxu0 %vm2017_vm1, %v478_v39 }
 0x103   : > { %1389 = vmatpush1.msk.msra.mxu0 %vm2022_vm3, %v477_v38 }
 0x104   : > { %v418_v34 = vpop.permute.xlu0 %417  ;;  %642 = vmatprep.subr.mxu0 %v1728_v5 }
 0x105   : > { %v430_v41 = vsel %vm429_vm10, %v416_v29, %v418_v34  ;;  %v431_v43 = vsel %vm429_vm10, %v418_v34, %v1913_v44  ;;  %643 = vmatpush1.msra.mxu0 %v1783_v8 }
 0x106   : > { %v562_v40 = vpop.permute.xlu1 %561  ;;  %1391 = vmatprep.subr.msk.mxu0 %vm2037_vm0, %v431_v43 }
 0x107   : > { %1393 = vmatpush1.msk.msra.mxu0 %vm2041_vm8, %v430_v41 }
 0x108   : > { %v385_v31 = vpop.permute.xlu0 %384 }
 0x109   : > { %v397_v48 = vsel %vm396_vm11, %v383_v36, %v385_v31  ;;  %v398_v5 = vsel %vm396_vm11, %v385_v31, %v1902_v42 }
 0x10a   : > { %v350_v46 = vpop.permute.xlu1 %349  ;;  %1395 = vmatprep.subr.msk.mxu0 %vm2017_vm1, %v398_v5 }
 0x10b   : > { %1397 = vmatpush1.msk.msra.mxu0 %vm2022_vm3, %v397_v48 }
 0x10c   : > { %v564_v8 = vpop.permute.xlu0 %563 }
 0x10d   : > { %v577_v49 = vsel %vm575_vm12, %v564_v8, %v1942_v55  ;;  %v576_v50 = vsel %vm575_vm12, %v562_v40, %v564_v8  ;;  %v321_v55 = vand.u32 15, %v315_v53 }
 0x10e   : > { %v1545_v44 = vpop.permute.xlu1 %1544  ;;  %648 = vmatprep.subr.mxu0 %v577_v49 }
 0x10f   : > { %649 = vmatpush1.msra.mxu0 %v576_v50  ;;  %v1547_v58 = vunpack.i.h.bf16 %v1545_v44  ;;  %v1546_v10 = vunpack.i.l.bf16 %v1545_v44  ;;  %vm2094_vm4 = vcmp.ne.s32.totalorder %v321_v55, 15 }
 0x110   : > { %v352_v42 = vpop.permute.xlu0 %351 }
 0x111   : > { %v364_v6 = vsel %vm363_vm13, %v350_v46, %v352_v42  ;;  %v365_v56 = vsel %vm363_vm13, %v352_v42, %v1935_v52  ;;  %v608_v14 = vsel %vm602_vm5, %v1546_v10, %v1547_v58  ;;  %v1117_v58 = vld [vmem:[%s2244_s5 + $0x58] sm:$0xff] }
 0x112   : > { %v1555_v7 = vpop.permute.xlu1 %1554  ;;  %1399 = vmatprep.subr.msk.mxu0 %vm2037_vm0, %v365_v56  ;;  %v1121_v56 = vld [vmem:[%s2244_s5 + $0x78] sm:$0xff] }
 0x113   : > { %1401 = vmatpush1.msk.msra.mxu0 %vm2041_vm8, %v364_v6  ;;  %v1557_v9 = vunpack.i.h.bf16 %v1555_v7  ;;  %v1556_v16 = vunpack.i.l.bf16 %v1555_v7  ;;  %v1120_v7 = vld [vmem:[%s2244_s5 + $0x70] sm:$0xff]  ;;  %1219 = vmatprep.subr.mxu1 %v1121_v56 }
 0x114   : > { %v1540_v60 = vpop.permute.xlu0 %1539  ;;  %1402 = vmatmul.mubr.msk.f32.vlgmr.msra.gmra.mxu0 %vm616_vm14, %v1954_v62  ;;  %1220 = vmatpush1.msra.mxu1 %v1120_v7 }
 0x115   : > { %v1542_v61 = vunpack.i.h.bf16 %v1540_v60  ;;  %v1541_v63 = vunpack.i.l.bf16 %v1540_v60  ;;  %825 = vmatprep.mubr.f32.mxu0 %v1594_v0  ;;  %v482_v26 = vsel %vm476_vm9, %v1556_v16, %v1557_v9  ;;  %v1116_v60 = vld [vmem:[%s2244_s5 + $0x50] sm:$0xff]  ;;  %1221 = vmatprep.subr.mxu1 %v1119_v57 }
 0x116   : > { %v428_v52 = vpop.permute.xlu1 %427 }
 0x117   : > { %v548_v1 = vsel %vm542_vm2, %v1541_v63, %v1542_v61  ;;  %v547_v12 = vsel %vm542_vm2, %v1827_v20, %v1541_v63  ;;  %v607_v20 = vsel %vm602_vm5, %v1847_v25, %v1546_v10  ;;  %vm2112_vm2 = vcmp.ne.s32.totalorder %v321_v55, 0  ;;  %v1118_v55 = vld [vmem:[%s2244_s5 + $0x60] sm:$0xff]  ;;  %v1115_v10 = vld [vmem:[%s2244_s5 + $0x48] sm:$0xff]  ;;  %v1113_v63 = vld [vmem:[%s2244_s5 + $0x38] sm:$0xff] }
 0x118   : > { %v1550_v15 = vpop.permute.xlu0 %1549  ;;  %1429 = vmatprep.subr.msk.mxu0 %vm2089_vm15, %v548_v1  ;;  %v481_v25 = vsel %vm476_vm9, %v1887_v37, %v1556_v16  ;;  %vm2281_vm5 = vcmask 523264   ;;  %1222 = vmatpush1.msra.mxu1 %v1118_v55  ;;  %v1114_v61 = vld [vmem:[%s2244_s5 + $0x40] sm:$0xff]  ;;  %v1109_v1 = vld [vmem:[%s2244_s5 + $0x18] sm:$0xff] }
 0x119   : > { %v1552_v54 = vunpack.i.h.bf16 %v1550_v15  ;;  %v1551_v17 = vunpack.i.l.bf16 %v1550_v15  ;;  %1431 = vmatpush1.msk.msra.mxu0 %vm2094_vm4, %v547_v12  ;;  %vm2283_vm9 = vmmov %vm2281_vm5  ;;  %1223 = vmatprep.subr.mxu1 %v1117_v58  ;;  %v1107_v15 = vld [vmem:[%s2244_s5 + $0x8] sm:$0xff] }
 0x11a   : > { %777 = vmatprep.subr.mxu0 %v608_v14  ;;  %v395_v22 = vpop.permute.xlu1 %394  ;;  %1224 = vmatpush1.msra.mxu1 %v1116_v60  ;;  %v1108_v14 = vld [vmem:[%s2244_s5 + $0x10] sm:$0xff] }
 0x11b   : > { %778 = vmatpush1.msra.mxu0 %v607_v20  ;;  %v515_v23 = vsel %vm509_vm6, %v1551_v17, %v1552_v54  ;;  %v514_v24 = vsel %vm509_vm6, %v1829_v21, %v1551_v17  ;;  %vm2282_vm6 = vmmov %vm2281_vm5  ;;  %1225 = vmatprep.subr.mxu1 %v1115_v10  ;;  %v1106_v17 = vld [vmem:[%s2244_s5] sm:$0xff] }
 0x11c   : > { %v426_v27 = vpop.permute.xlu0 %425  ;;  %1433 = vmatprep.subr.msk.mxu0 %vm2106_vm7, %v515_v23  ;;  %1226 = vmatpush1.msra.mxu1 %v1114_v61 }
 0x11d   : > { %1435 = vmatpush1.msk.msra.mxu0 %vm2112_vm2, %v514_v24  ;;  %v435_v11 = vsel %vm429_vm10, %v426_v27, %v428_v52  ;;  %v434_v30 = vsel %vm429_vm10, %v1877_v35, %v426_v27  ;;  %vm2284_vm10 = vmmov %vm2281_vm5  ;;  %v1111_v52 = vld [vmem:[%s2244_s5 + $0x28] sm:$0xff]  ;;  %1227 = vmatprep.subr.mxu1 %v1113_v63 }
 0x11e   : > { %1437 = vmatprep.subr.msk.mxu0 %vm2089_vm15, %v482_v26  ;;  %v574_v28 = vpop.permute.xlu1 %573  ;;  %1228 = vmatpush1.msra.mxu1 %v1112_v2 }
 0x11f   : > { %1439 = vmatpush1.msk.msra.mxu0 %vm2094_vm4, %v481_v25  ;;  %1229 = vmatprep.subr.mxu1 %v1111_v52 }
 0x120   : > { %v393_v21 = vpop.permute.xlu0 %392  ;;  %783 = vmatprep.subr.mxu0 %v1594_v0  ;;  %1230 = vmatpush1.msra.mxu1 %v1110_v3 }
 0x121   : > { %v402_v29 = vsel %vm396_vm11, %v393_v21, %v395_v22  ;;  %784 = vmatpush1.msra.mxu0 %v1705_v4  ;;  %v401_v37 = vsel %vm396_vm11, %v1923_v47, %v393_v21  ;;  %1231 = vmatprep.subr.mxu1 %v1109_v1  ;;  %vm2285_vm11 = vmmov %vm2281_vm5 }
 0x122   : > { %1441 = vmatprep.subr.msk.mxu0 %vm2106_vm7, %v435_v11  ;;  %v362_v35 = vpop.permute.xlu1 %361  ;;  %1232 = vmatpush1.msra.mxu1 %v1108_v14 }
 0x123   : > { %1443 = vmatpush1.msk.msra.mxu0 %vm2112_vm2, %v434_v30  ;;  %1233 = vmatprep.subr.mxu1 %v1107_v15 }
 0x124   : > { %v572_v32 = vpop.permute.xlu0 %571  ;;  %1445 = vmatprep.subr.msk.mxu0 %vm2089_vm15, %v402_v29  ;;  %1234 = vmatpush1.msra.mxu1 %v1106_v17 }
 0x125   : > { %v580_v33 = vsel %vm575_vm12, %v1915_v45, %v572_v32  ;;  %1447 = vmatpush1.msk.msra.mxu0 %vm2094_vm4, %v401_v37  ;;  %v581_v4 = vsel %vm575_vm12, %v572_v32, %v574_v28  ;;  %vm2286_vm12 = vmmov %vm2281_vm5 }
 0x126   : > { %789 = vmatprep.subr.mxu0 %v581_v4 }
 0x127   : > { %790 = vmatpush1.msra.mxu0 %v580_v33  ;;  %v1087_v33 = vstv %s1453_s24 }
 0x128   : > { %v360_v13 = vpop.permute.xlu0 %359 }
 0x129   : > { %v368_v36 = vsel %vm363_vm13, %v1947_v59, %v360_v13  ;;  %v369_v47 = vsel %vm363_vm13, %v360_v13, %v362_v35 }
 0x12a   : > { %1449 = vmatprep.subr.msk.mxu0 %vm2106_vm7, %v369_v47 }
 0x12b   : > { %1451 = vmatpush1.msk.msra.mxu0 %vm2112_vm2, %v368_v36 }
 0x12c   : > { %1452 = vmatmul.mubr.msk.f32.vlgmr.msra.gmra.mxu0 %vm616_vm14, %v1954_v62  ;;  %1141 = vmatprep.subr.mxu0 %v1121_v56 }
 0x12d   : > { %1189 = vmatprep.mubr.f32.mxu0 %v1594_v0  ;;  %1142 = vmatpush1.msra.mxu0 %v1120_v7 }
 0x12e   : > { %1143 = vmatprep.subr.mxu0 %v1119_v57 }
 0x12f   : > { %1144 = vmatpush1.msra.mxu0 %v1118_v55 }
 0x130   : > { %1145 = vmatprep.subr.mxu0 %v1117_v58 }
 0x131   : > { %1146 = vmatpush1.msra.mxu0 %v1116_v60 }
 0x132   : > { %1147 = vmatprep.subr.mxu0 %v1115_v10 }
 0x133   : > { %1148 = vmatpush1.msra.mxu0 %v1114_v61 }
 0x134   : > { %1149 = vmatprep.subr.mxu0 %v1113_v63 }
 0x135   : > { %1150 = vmatpush1.msra.mxu0 %v1112_v2 }
 0x136   : > { %1151 = vmatprep.subr.mxu0 %v1111_v52 }
 0x137   : > { %1152 = vmatpush1.msra.mxu0 %v1110_v3 }
 0x138   : > { %1153 = vmatprep.subr.mxu0 %v1109_v1 }
 0x139   : > { %1154 = vmatpush1.msra.mxu0 %v1108_v14 }
 0x13a   : > { %1155 = vmatprep.subr.mxu0 %v1107_v15 }
 0x13b   : > { %1156 = vmatpush1.msra.mxu0 %v1106_v17 }
 0x184   : > { %v757_v45 = vpop.f32.mrf.mxu1 }
 0x186   : > { %v2159_v38 = vpop.f32.mrf.mxu1 }
 0x1b4   : > { %v1069_v39 = vpop.f32.mrf.mxu1 }
 0x1b5   : > { %v1074_v34 = vsel %vm2281_vm5, %v1069_v39, 0.0 }
 0x1b6   : > { %v1071_v59 = vpop.f32.mrf.mxu1  ;;  %1075 = vadd.xlane.f32.xlu0 %v1074_v34 }
 0x1b7   : > { %v1091_v40 = vsel %vm2282_vm6, %v1071_v59, 0.0 }
 0x1b8   : > { %1092 = vadd.xlane.f32.xlu1 %v1091_v40 }
 0x1d4   : > { %v686_v41 = vpop.f32.mrf.mxu0 }
 0x1d6   : > { %v688_v43 = vpop.f32.mrf.mxu0 }
 0x1d7   : > { %v831_v31 = vadd.f32 %v688_v43, %v686_v41 }
 0x1d9   : > { %832 = vadd.xlane.f32.xlu1 %v831_v31 }
 0x1ec   : > { %v2163_v46 = vpop.f32.mrf.mxu0 }
 0x1ed   : > { %v852_v6 = vadd.f32 %v2163_v46, %v2159_v38 }
 0x1ee   : > { %v829_v62 = vpop.f32.mrf.mxu0 }
 0x1ef   : > { %v846_v62 = vstv %s296_s25 }
 0x23f   : > { %v1076_v48 = vpop.xlane.xlu0 %1075 }
 0x240   : > { %v1078_v0 = vmul.f32 0.015625, %v1076_v48 }
 0x241   : > { %v1093_v5 = vpop.xlane.xlu1 %1092 }
 0x242   : > { %v2165_v8 = vsub.f32 %v1069_v39, %v1078_v0  ;;  %v1094_v44 = vmul.f32 0.015625, %v1093_v5 }
 0x244   : > { %v2167_v49 = vsub.f32 %v1071_v59, %v1094_v44  ;;  %v1080_v50 = vmul.f32 %v2165_v8, %v2165_v8 }
 0x246   : > { %v1081_v51 = vsel %vm2283_vm9, %v1080_v50, 0.0  ;;  %v1096_v53 = vmul.f32 %v2167_v49, %v2167_v49 }
 0x247   : > { %1082 = vadd.xlane.f32.xlu0 %v1081_v51 }
 0x248   : > { %v1097_v42 = vsel %vm2284_vm10, %v1096_v53, 0.0 }
 0x24b   : > { %1098 = vadd.xlane.f32.xlu0 %v1097_v42 }
 0x24f   : > { %853 = vadd.xlane.f32.xlu0 %v852_v6 }
 0x262   : > { %v833_v9 = vpop.xlane.xlu1 %832 }
 0x263   : > { %v835_v12 = vmul.f32 0.00390625, %v833_v9 }
 0x265   : > { %v836_v16 = vsub.f32 %v686_v41, %v835_v12  ;;  %v837_v54 = vsub.f32 %v688_v43, %v835_v12 }
 0x267   : > { %v838_v18 = vmul.f32 %v836_v16, %v836_v16  ;;  %v839_v20 = vmul.f32 %v837_v54, %v837_v54 }
 0x269   : > { %v840_v19 = vadd.f32 %v839_v20, %v838_v18 }
 0x26b   : > { %841 = vadd.xlane.f32.xlu1 %v840_v19 }
 0x2d0   : > { %v1083_v22 = vpop.xlane.xlu0 %1082 }
 0x2d1   : > { %v1084_v23 = vmul.f32 0.015625, %v1083_v22 }
 0x2d3   : > { %v1085_v24 = vadd.f32 1e-05, %v1084_v23 }
 0x2d4   : > { %v1099_v26 = vpop.xlane.xlu0 %1098 }
 0x2d5   : > { %1558 = vrsqrt.f32 %v1085_v24  ;;  %v1100_v27 = vmul.f32 0.015625, %v1099_v26 }
 0x2d7   : > { %v1101_v25 = vadd.f32 1e-05, %v1100_v27 }
 0x2d8   : > { %v854_v11 = vpop.xlane.xlu0 %853 }
 0x2d9   : > { %1560 = vrsqrt.f32 %v1101_v25  ;;  %v855_v21 = vmul.f32 0.00390625, %v854_v11 }
 0x2db   : > { %v856_v28 = vsub.f32 %v2159_v38, %v855_v21  ;;  %v857_v29 = vsub.f32 %v2163_v46, %v855_v21 }
 0x2dd   : > { %v858_v30 = vmul.f32 %v856_v28, %v856_v28  ;;  %v859_v37 = vmul.f32 %v857_v29, %v857_v29 }
 0x2df   : > { %v860_v32 = vadd.f32 %v859_v37, %v858_v30 }
 0x2e1   : > { %861 = vadd.xlane.f32.xlu0 %v860_v32 }
 0x2e2   : > { %v1559_v4 = vpop.eup %1558 }
 0x2e3   : > { %v1088_v35 = vmul.f32 %v1559_v4, %v1087_v33 }
 0x2e5   : > { %v1089_v13 = vmul.f32 %v1088_v35, %v2165_v8 }
 0x2e6   : > { %v1561_v36 = vpop.eup %1560 }
 0x2e7   : > { %v1090_v47 = vmax.f32 %v1089_v13, 0.0  ;;  %v1103_v45 = vmul.f32 %v1561_v36, %v1087_v33 }
 0x2e9   : > { %1480 = vmatmul.mubr.msk.f32.vlgmr.msra.gmra.mxu0 %vm2285_vm11, %v1090_v47  ;;  %v1104_v39 = vmul.f32 %v1103_v45, %v2167_v49 }
 0x2eb   : > { %v1105_v34 = vmax.f32 %v1104_v39, 0.0 }
 0x2ed   : > { %1481 = vmatmul.mubr.msk.f32.vlgmr.msra.gmra.mxu1 %vm2286_vm12, %v1105_v34 }
 0x2f4   : > { %v842_v38 = vpop.xlane.xlu1 %841 }
 0x2f5   : > { %v843_v59 = vmul.f32 0.00390625, %v842_v38 }
 0x2f7   : > { %v844_v41 = vadd.f32 1e-05, %v843_v59 }
 0x2f9   : > { %1562 = vrsqrt.f32 %v844_v41 }
 0x306   : > { %v1563_v46 = vpop.eup %1562 }
 0x307   : > { %v847_v48 = vmul.f32 %v1563_v46, %v846_v62 }
 0x309   : > { %v848_v5 = vmul.f32 %v847_v48, %v836_v16  ;;  %v849_v44 = vmul.f32 %v847_v48, %v837_v54 }
 0x30b   : > { %v850_v49 = vmax.f32 %v848_v5, 0.0  ;;  %v851_v42 = vmax.f32 %v849_v44, 0.0 }
 0x36a   : > { %v862_v40 = vpop.xlane.xlu0 %861 }
 0x36b   : > { %v863_v43 = vmul.f32 0.00390625, %v862_v40 }
 0x36d   : > { %v864_v31 = vadd.f32 1e-05, %v863_v43 }
 0x36f   : > { %1564 = vrsqrt.f32 %v864_v31 }
 0x37c   : > { %v1565_v0 = vpop.eup %1564 }
 0x37d   : > { %v866_v8 = vmul.f32 %v1565_v0, %v846_v62 }
 0x37f   : > { %v867_v50 = vmul.f32 %v866_v8, %v856_v28  ;;  %v868_v6 = vmul.f32 %v866_v8, %v857_v29 }
 0x381   : > { %v869_v57 = vmax.f32 %v867_v50, 0.0  ;;  %v870_v60 = vmax.f32 %v868_v6, 0.0 }
 0x3a9   : > { %v1191_v51 = vpop.f32.mrf.mxu0 }
 0x3aa   : > { %v1196_v53 = vadd.f32 %v1191_v51, %v850_v49 }
 0x3ab   : > { %v1193_v56 = vpop.f32.mrf.mxu0 }
 0x3ac   : > { %1198 = vst [vmem:[%s294_s28] sm:$0xff] %v1196_v53  ;;  %v1197_v7 = vadd.f32 %v1193_v56, %v851_v42 }
 0x3ad   : > { %v1269_v55 = vpop.f32.mrf.mxu1 }
 0x3ae   : > { %1199 = vst [vmem:[%s294_s28 + $0x8] sm:$0xff] %v1197_v7  ;;  %v1274_v58 = vadd.f32 %v1269_v55, %v869_v57 }
 0x3af   : > { %v1271_v10 = vpop.f32.mrf.mxu1 }
 0x3b0   : > { %1482 = vst [vmem:[%s294_s28 + $0x10] sm:$0xff] %v1274_v58  ;;  %v1275_v61 = vadd.f32 %v1271_v10, %v870_v60 }
 0x3b2   : > { %1483 = vst [vmem:[%s294_s28 + $0x18] sm:$0xff] %v1275_v61 }
 0x3b3 PF: > { %s17_s21 = sadd.s32 1, %s1591_s21  }
 0x3b4   : > { %p14_p1 = scmp.ge.s32.totalorder %s17_s21, 4  }
 0x3b6   :  { %16 = sbr.rel (!%p14_p1) target bundleno = 1 (0x1), region = 85 }
 0x3bb   :  { %1303 = vsyncpa [#allocation5], 1 }
 0x3bc   :  { %1305 = vsyncpa [#allocation5 + $0x1], 1 }

</bundles_post_ra>
